<compile_context>
chip_gen: v7x
topology: tpu7x:2x2x1
jax: 0.10.0
libtpu: 0.0.40
codegen_flags: <defaults>
</compile_context>

<pallas_src>
import jax
import jax.numpy as jnp
import numpy as np
from jax.experimental import pallas as pl
from jax.experimental.pallas import tpu as pltpu

NPAD = 128      # lane-dense output width for every matmul
FC1_K = 512     # fc1 contraction (400 valid, padded to a multiple of 128)


def _round_up(x, m):
    return (x + m - 1) // m * m


def _row_tile(rows, cap=512):
    """Row tile: multiple of 16 (bf16 sublanes), >=2 grid steps when possible."""
    if rows >= 2 * cap:
        return cap
    return max(16, _round_up(-(-rows // 2), 16))


# ---------------------------------------------------------------------------
# Pallas kernels
# ---------------------------------------------------------------------------
def _conv_pool_kernel(cols_ref, w_ref, b_ref, o_ref):
    """Fused conv (im2col matmul) + bias + ReLU + 2x2 maxpool on a row tile.

    cols_ref: (4, TR, K) bf16  -- 4 pool-corner im2col slabs (batch*P merged)
    w_ref:    (K, 128)  bf16   -- conv weight, out channels padded to 128
    b_ref:    (1, 128)  f32
    o_ref:    (TR, 128) bf16   -- pooled, lane-dense output
    """
    w = w_ref[...]
    # Running max over the 4 pool corners (keeps only two corner results live).
    y = jnp.dot(cols_ref[0], w, preferred_element_type=jnp.float32)
    for i in range(1, 4):
        y = jnp.maximum(
            y, jnp.dot(cols_ref[i], w, preferred_element_type=jnp.float32))
    # Bias + ReLU once on the running max (bias is per-channel -> commutes).
    y = jnp.maximum(y + b_ref[...], 0.0)
    o_ref[...] = y.astype(o_ref.dtype)


def _fc_stack_kernel(x_ref, w1_ref, b1_ref, w2_ref, b2_ref, w3_ref, b3_ref,
                     w4_ref, b4_ref, o_ref):
    """fc1->fc4 fused; weights VMEM-resident; intermediates never leave VMEM."""
    f32 = jnp.float32
    h = jnp.dot(x_ref[...], w1_ref[...], preferred_element_type=f32) + b1_ref[...]
    h = jnp.maximum(h, 0.0).astype(jnp.bfloat16)
    h = jnp.dot(h, w2_ref[...], preferred_element_type=f32) + b2_ref[...]
    h = jnp.maximum(h, 0.0).astype(jnp.bfloat16)
    h = jnp.dot(h, w3_ref[...], preferred_element_type=f32) + b3_ref[...]
    h = jnp.maximum(h, 0.0).astype(jnp.bfloat16)
    h = jnp.dot(h, w4_ref[...], preferred_element_type=f32) + b4_ref[...]
    o_ref[...] = h.astype(o_ref.dtype)


# ---------------------------------------------------------------------------
# pallas_call wrappers
# ---------------------------------------------------------------------------
def conv_pool(cols, w2d, b2d):
    """cols: (4, R, K) bf16; w2d: (K, 128) bf16; b2d: (1, 128) f32 -> (Rp, 128) bf16."""
    _, R, K = cols.shape
    N = w2d.shape[1]
    TR = _row_tile(R)
    Rp = _round_up(R, TR)
    if Rp != R:
        cols = jnp.pad(cols, ((0, 0), (0, Rp - R), (0, 0)))
    return pl.pallas_call(
        _conv_pool_kernel,
        out_shape=jax.ShapeDtypeStruct((Rp, N), jnp.bfloat16),
        grid=(Rp // TR,),
        in_specs=[
            pl.BlockSpec((4, TR, K), lambda m: (0, m, 0)),
            pl.BlockSpec((K, N), lambda m: (0, 0)),
            pl.BlockSpec((1, N), lambda m: (0, 0)),
        ],
        out_specs=pl.BlockSpec((TR, N), lambda m: (m, 0)),
        compiler_params=pltpu.CompilerParams(dimension_semantics=("parallel",)),
    )(cols, w2d, b2d)


def fc_stack(x, w1, b1, w2, b2, w3, b3, w4, b4, *, tile_m):
    """x: (Bp, FC1_K) bf16 -> (Bp, 128) f32.  Whole fc1..fc4 stack in one kernel."""
    Bp, K = x.shape
    N = w4.shape[1]
    const = lambda m: (0, 0)
    return pl.pallas_call(
        _fc_stack_kernel,
        out_shape=jax.ShapeDtypeStruct((Bp, N), jnp.float32),
        grid=(Bp // tile_m,),
        in_specs=[
            pl.BlockSpec((tile_m, K), lambda m: (m, 0)),
            pl.BlockSpec(w1.shape, const), pl.BlockSpec(b1.shape, const),
            pl.BlockSpec(w2.shape, const), pl.BlockSpec(b2.shape, const),
            pl.BlockSpec(w3.shape, const), pl.BlockSpec(b3.shape, const),
            pl.BlockSpec(w4.shape, const), pl.BlockSpec(b4.shape, const),
        ],
        out_specs=pl.BlockSpec((tile_m, N), lambda m: (m, 0)),
        compiler_params=pltpu.CompilerParams(dimension_semantics=("parallel",)),
    )(x, w1, b1, w2, b2, w3, b3, w4, b4)


# ---------------------------------------------------------------------------
# XLA glue: pool-corner-ordered im2col (batch merged into rows, K unpadded Cin)
# ---------------------------------------------------------------------------
def _corner_cols(x, k, pool):
    """x: (B, H, W, C) NHWC -> (4, B*P, Kp) with P = (OH//2)*(OW//2).

    Corner c = (dh, dw) of the 2x2 pool window; row r = b*P + ph*OW2 + pw;
    feature f = (i*k + j)*C + ci (matches _conv_weight ordering).  K = k*k*C
    is zero-padded up to a multiple of 16 (bf16 sublane packing on the weight).
    """
    B, H, W, C = x.shape
    OH, OW = H - k + 1, W - k + 1
    OH2, OW2 = OH // pool, OW // pool
    K = k * k * C
    Kp = _round_up(K, 16)
    corners = []
    for dh in range(pool):
        for dw in range(pool):
            taps = []
            for i in range(k):
                for j in range(k):
                    hs, ws = dh + i, dw + j
                    sl = jax.lax.slice(
                        x,
                        (0, hs, ws, 0),
                        (B, hs + pool * (OH2 - 1) + 1,
                         ws + pool * (OW2 - 1) + 1, C),
                        (1, pool, pool, 1))              # (B, OH2, OW2, C)
                    taps.append(sl)
            c = jnp.concatenate(taps, axis=-1)            # (B, OH2, OW2, K)
            corners.append(c.reshape(B * OH2 * OW2, K))
    cols = jnp.stack(corners, axis=0)                     # (4, B*P, K)
    if Kp != K:
        cols = jnp.pad(cols, ((0, 0), (0, 0), (0, Kp - K)))
    return cols, (OH2, OW2)


# ---------------------------------------------------------------------------
# One-time parameter preparation (padded / permuted / bf16 weights)
# ---------------------------------------------------------------------------
def _conv_weight(w, b, kpad, cout_pad=NPAD):
    """OIHW conv weight -> (kpad, cout_pad) bf16 matmul weight + (1, cout_pad) f32 bias."""
    Cout, Cin, k, _ = w.shape
    w2d = jnp.transpose(w, (2, 3, 1, 0)).reshape(k * k * Cin, Cout)
    wp = jnp.zeros((kpad, cout_pad), jnp.bfloat16)
    wp = wp.at[:k * k * Cin, :Cout].set(w2d.astype(jnp.bfloat16))
    bp = jnp.zeros((1, cout_pad), jnp.float32).at[0, :Cout].set(b)
    return wp, bp


def _fc_weights(params):
    """Pad fc widths to 128 (K to 512 for fc1), fold the NCHW flatten permutation into fc1."""
    # fc1_w rows are indexed c*25 + (h*5 + w) (PyTorch view(-1, 400) from NCHW).
    # Our flattened activation index is (h*5 + w)*16 + c.
    w1 = params["fc1_w"].reshape(16, 25, 120)                      # [c, hw, o]
    w1 = jnp.transpose(w1, (1, 0, 2)).reshape(400, 120)            # [hw*c, o]
    w1p = jnp.zeros((FC1_K, NPAD), jnp.bfloat16)
    w1p = w1p.at[:400, :120].set(w1.astype(jnp.bfloat16))
    b1p = jnp.zeros((1, NPAD), jnp.float32).at[0, :120].set(params["fc1_b"])

    def padw(w, b):
        I, O = w.shape
        wp = jnp.zeros((NPAD, NPAD), jnp.bfloat16).at[:I, :O].set(w.astype(jnp.bfloat16))
        bp = jnp.zeros((1, NPAD), jnp.float32).at[0, :O].set(b)
        return wp, bp

    w2p, b2p = padw(params["fc2_w"], params["fc2_b"])
    w3p, b3p = padw(params["fc3_w"], params["fc3_b"])
    w4p, b4p = padw(params["fc4_w"], params["fc4_b"])
    return w1p, b1p, w2p, b2p, w3p, b3p, w4p, b4p


def prepare_params(params):
    """Called once, outside the jitted forward (no per-call weight rebuild)."""
    k1 = _round_up(5 * 5 * params["conv1_w"].shape[1], 16)   # 75 -> 80
    k2 = _round_up(5 * 5 * params["conv2_w"].shape[1], 16)   # 150 -> 160
    return {
        "conv1": _conv_weight(params["conv1_w"], params["conv1_b"], k1),
        "conv2": _conv_weight(params["conv2_w"], params["conv2_b"], k2),
        "fc": _fc_weights(params),
    }


# ---------------------------------------------------------------------------
# Parameters (deterministic, PyTorch-default-style uniform(+-1/sqrt(fan_in)))
# ---------------------------------------------------------------------------
def init_params(key):
    def uni(k, shape, fan_in):
        bound = 1.0 / np.sqrt(fan_in)
        return jax.random.uniform(k, shape, jnp.float32, -bound, bound)

    ks = jax.random.split(key, 12)
    return {
        "conv1_w": uni(ks[0], (6, 3, 5, 5), 3 * 25),
        "conv1_b": uni(ks[1], (6,), 3 * 25),
        "conv2_w": uni(ks[2], (16, 6, 5, 5), 6 * 25),
        "conv2_b": uni(ks[3], (16,), 6 * 25),
        # fc weights stored pre-transposed as (in, out)
        "fc1_w": uni(ks[4], (16 * 5 * 5, 120), 16 * 5 * 5),
        "fc1_b": uni(ks[5], (120,), 16 * 5 * 5),
        "fc2_w": uni(ks[6], (120, 84), 120),
        "fc2_b": uni(ks[7], (84,), 120),
        "fc3_w": uni(ks[8], (84, 32), 84),
        "fc3_b": uni(ks[9], (32,), 84),
        "fc4_w": uni(ks[10], (32, 10), 32),
        "fc4_b": uni(ks[11], (10,), 32),
    }


# ---------------------------------------------------------------------------
# Forward pass (mirrors Net.forward)
# ---------------------------------------------------------------------------
def net_forward(prep, x_nchw):
    B = x_nchw.shape[0]

    # NCHW -> NHWC bf16 (no Cin padding; K handled per-stage).
    x = jnp.transpose(x_nchw, (0, 2, 3, 1)).astype(jnp.bfloat16)

    # Stage 1: conv1 + ReLU + 2x2 pool
    w1c, b1c = prep["conv1"]
    cols1, (H1, W1) = _corner_cols(x, 5, 2)                   # (4, B*196, 80)
    y1 = conv_pool(cols1, w1c, b1c)                           # (Rp1, 128) bf16
    y1 = y1[:B * H1 * W1].reshape(B, H1, W1, NPAD)[..., :6]   # (B, 14, 14, 6)

    # Stage 2: conv2 + ReLU + 2x2 pool
    w2c, b2c = prep["conv2"]
    cols2, (H2, W2) = _corner_cols(y1, 5, 2)                  # (4, B*25, 160)
    y2 = conv_pool(cols2, w2c, b2c)                           # (Rp2, 128) bf16
    y2 = y2[:B * H2 * W2].reshape(B, H2 * W2, NPAD)[:, :, :16]  # (B, 25, 16)

    # Fused fc stack: 400 valid features padded to FC1_K=512, batch padded to TM.
    xf = y2.reshape(B, 16 * H2 * W2)                          # (B, 400) bf16
    TM = min(256, max(16, _round_up(-(-B // 2), 16)))
    Bp = _round_up(B, TM)
    xf = jnp.pad(xf, ((0, Bp - B), (0, FC1_K - xf.shape[1])))
    out = fc_stack(xf, *prep["fc"], tile_m=TM)                # (Bp, 128) f32
    return out[:B, :10]


# Pure-JAX reference (sanity check only).
def net_reference(params, x_nchw):
    from jax import lax

    def conv(x, w, b):
        y = lax.conv_general_dilated(
            x, w, (1, 1), "VALID", dimension_numbers=("NCHW", "OIHW", "NCHW"))
        return jax.nn.relu(y + b.reshape(1, -1, 1, 1))

    def pool(x):
        return lax.reduce_window(
            x, -jnp.inf, lax.max, (1, 1, 2, 2), (1, 1, 2, 2), "VALID")

    x = pool(conv(x_nchw, params["conv1_w"], params["conv1_b"]))
    x = pool(conv(x, params["conv2_w"], params["conv2_b"]))
    x = x.reshape(x.shape[0], -1)
    x = jax.nn.relu(x @ params["fc1_w"] + params["fc1_b"])
    x = jax.nn.relu(x @ params["fc2_w"] + params["fc2_b"])
    x = jax.nn.relu(x @ params["fc3_w"] + params["fc3_b"])
    return x @ params["fc4_w"] + params["fc4_b"]


if __name__ == "__main__":
    key = jax.random.PRNGKey(0)
    pkey, xkey = jax.random.split(key)
    params = init_params(pkey)
    prep = prepare_params(params)                      # one-time weight prep
    x = jax.random.normal(xkey, (2, 3, 32, 32), jnp.float32)  # NCHW, CIFAR-sized

    fwd = jax.jit(net_forward)
    out = jax.block_until_ready(fwd(prep, x))
    assert out.shape == (2, 10)

    ref = jax.block_until_ready(net_reference(params, x))
    # bf16 streams with f32 accumulation: loosened (but still meaningful) tolerance.
    np.testing.assert_allclose(np.asarray(out), np.asarray(ref),
                               rtol=5e-2, atol=5e-2)
    print("KERNEL_OK")
</pallas_src>

<mosaic_0001>
module attributes {stable_mosaic.version = 11 : i64} {
  func.func @_conv_pool_kernel(%arg0: i32, %arg1: memref<4x208x80xbf16, #tpu.memory_space<vmem>>, %arg2: memref<80x128xbf16, #tpu.memory_space<vmem>>, %arg3: memref<1x128xf32, #tpu.memory_space<vmem>>, %arg4: memref<208x128xbf16, #tpu.memory_space<vmem>>) attributes {dimension_semantics = [#tpu.dimension_semantics<parallel>], iteration_bounds = array<i64: 2>, scalar_prefetch = 0 : i64, scratch_operands = 0 : i64, tpu.core_type = #tpu.core_type<tc>, window_params = [{transform_indices = @transform_0, window_bounds = array<i64: 4, 208, 80>}, {pipeline_mode = #tpu.pipeline_mode<synchronous>, transform_indices = @transform_1, window_bounds = array<i64: 80, 128>}, {pipeline_mode = #tpu.pipeline_mode<synchronous>, transform_indices = @transform_2, window_bounds = array<i64: 1, 128>}, {transform_indices = @transform_3, window_bounds = array<i64: 208, 128>}]} {
    %c0 = arith.constant 0 : index
    %c0_0 = arith.constant 0 : index
    %0 = vector.load %arg2[%c0, %c0_0] : memref<80x128xbf16, #tpu.memory_space<vmem>>, vector<80x128xbf16>
    %c0_1 = arith.constant 0 : index
    %c0_2 = arith.constant 0 : index
    %c0_3 = arith.constant 0 : index
    %1 = vector.load %arg1[%c0_1, %c0_2, %c0_3] : memref<4x208x80xbf16, #tpu.memory_space<vmem>>, vector<1x208x80xbf16>
    %2 = vector.shape_cast %1 : vector<1x208x80xbf16> to vector<208x80xbf16>
    %cst = arith.constant dense<0.000000e+00> : vector<208x128xf32>
    %3 = tpu.matmul %2, %0, %cst {dimension_numbers = #tpu.dot_dimension_numbers<[1], [0], [0], [1], [0, 0, 1, 1], [], []>} : vector<208x80xbf16>, vector<80x128xbf16>, vector<208x128xf32> -> vector<208x128xf32>
    %c1 = arith.constant 1 : index
    %c0_4 = arith.constant 0 : index
    %c0_5 = arith.constant 0 : index
    %4 = vector.load %arg1[%c1, %c0_4, %c0_5] : memref<4x208x80xbf16, #tpu.memory_space<vmem>>, vector<1x208x80xbf16>
    %5 = vector.shape_cast %4 : vector<1x208x80xbf16> to vector<208x80xbf16>
    %cst_6 = arith.constant dense<0.000000e+00> : vector<208x128xf32>
    %6 = tpu.matmul %5, %0, %cst_6 {dimension_numbers = #tpu.dot_dimension_numbers<[1], [0], [0], [1], [0, 0, 1, 1], [], []>} : vector<208x80xbf16>, vector<80x128xbf16>, vector<208x128xf32> -> vector<208x128xf32>
    %7 = arith.maximumf %3, %6 : vector<208x128xf32>
    %c2 = arith.constant 2 : index
    %c0_7 = arith.constant 0 : index
    %c0_8 = arith.constant 0 : index
    %8 = vector.load %arg1[%c2, %c0_7, %c0_8] : memref<4x208x80xbf16, #tpu.memory_space<vmem>>, vector<1x208x80xbf16>
    %9 = vector.shape_cast %8 : vector<1x208x80xbf16> to vector<208x80xbf16>
    %cst_9 = arith.constant dense<0.000000e+00> : vector<208x128xf32>
    %10 = tpu.matmul %9, %0, %cst_9 {dimension_numbers = #tpu.dot_dimension_numbers<[1], [0], [0], [1], [0, 0, 1, 1], [], []>} : vector<208x80xbf16>, vector<80x128xbf16>, vector<208x128xf32> -> vector<208x128xf32>
    %11 = arith.maximumf %7, %10 : vector<208x128xf32>
    %c3 = arith.constant 3 : index
    %c0_10 = arith.constant 0 : index
    %c0_11 = arith.constant 0 : index
    %12 = vector.load %arg1[%c3, %c0_10, %c0_11] : memref<4x208x80xbf16, #tpu.memory_space<vmem>>, vector<1x208x80xbf16>
    %13 = vector.shape_cast %12 : vector<1x208x80xbf16> to vector<208x80xbf16>
    %cst_12 = arith.constant dense<0.000000e+00> : vector<208x128xf32>
    %14 = tpu.matmul %13, %0, %cst_12 {dimension_numbers = #tpu.dot_dimension_numbers<[1], [0], [0], [1], [0, 0, 1, 1], [], []>} : vector<208x80xbf16>, vector<80x128xbf16>, vector<208x128xf32> -> vector<208x128xf32>
    %15 = arith.maximumf %11, %14 : vector<208x128xf32>
    %c0_13 = arith.constant 0 : index
    %c0_14 = arith.constant 0 : index
    %16 = vector.load %arg3[%c0_13, %c0_14] : memref<1x128xf32, #tpu.memory_space<vmem>>, vector<1x128xf32>
    %17 = vector.broadcast %16 : vector<1x128xf32> to vector<208x128xf32>
    %18 = arith.addf %15, %17 : vector<208x128xf32>
    %cst_15 = arith.constant 0.000000e+00 : f32
    %19 = vector.broadcast %cst_15 : f32 to vector<208x128xf32>
    %20 = arith.maximumf %18, %19 : vector<208x128xf32>
    %21 = arith.truncf %20 : vector<208x128xf32> to vector<208x128xbf16>
    %c0_16 = arith.constant 0 : index
    %c0_17 = arith.constant 0 : index
    %22 = vector.load %arg4[%c0_16, %c0_17] : memref<208x128xbf16, #tpu.memory_space<vmem>>, vector<208x128xbf16>
    tpu.vector_store %arg4[%c0_16, %c0_17], %21 {strides = array<i32>} : memref<208x128xbf16, #tpu.memory_space<vmem>>, vector<208x128xbf16>,
    return
  }
  func.func @transform_0(%arg0: i32) -> (i32, i32, i32) {
    %c0_i32 = arith.constant 0 : i32
    %c0_i32_0 = arith.constant 0 : i32
    %c0_i32_1 = arith.constant 0 : i32
    return %c0_i32, %arg0, %c0_i32_0 : i32, i32, i32
  }
  func.func @transform_1(%arg0: i32) -> (i32, i32) {
    %c0_i32 = arith.constant 0 : i32
    %c0_i32_0 = arith.constant 0 : i32
    %c0_i32_1 = arith.constant 0 : i32
    return %c0_i32, %c0_i32_0 : i32, i32
  }
  func.func @transform_2(%arg0: i32) -> (i32, i32) {
    %c0_i32 = arith.constant 0 : i32
    %c0_i32_0 = arith.constant 0 : i32
    %c0_i32_1 = arith.constant 0 : i32
    return %c0_i32, %c0_i32_0 : i32, i32
  }
  func.func @transform_3(%arg0: i32) -> (i32, i32) {
    %c0_i32 = arith.constant 0 : i32
    %c0_i32_0 = arith.constant 0 : i32
    return %arg0, %c0_i32 : i32, i32
  }
}

module attributes {stable_mosaic.version = 11 : i64} {
  func.func @_conv_pool_kernel(%arg0: i32, %arg1: memref<4x32x160xbf16, #tpu.memory_space<vmem>>, %arg2: memref<160x128xbf16, #tpu.memory_space<vmem>>, %arg3: memref<1x128xf32, #tpu.memory_space<vmem>>, %arg4: memref<32x128xbf16, #tpu.memory_space<vmem>>) attributes {dimension_semantics = [#tpu.dimension_semantics<parallel>], iteration_bounds = array<i64: 2>, scalar_prefetch = 0 : i64, scratch_operands = 0 : i64, tpu.core_type = #tpu.core_type<tc>, window_params = [{transform_indices = @transform_0, window_bounds = array<i64: 4, 32, 160>}, {pipeline_mode = #tpu.pipeline_mode<synchronous>, transform_indices = @transform_1, window_bounds = array<i64: 160, 128>}, {pipeline_mode = #tpu.pipeline_mode<synchronous>, transform_indices = @transform_2, window_bounds = array<i64: 1, 128>}, {transform_indices = @transform_3, window_bounds = array<i64: 32, 128>}]} {
    %c0 = arith.constant 0 : index
    %c0_0 = arith.constant 0 : index
    %0 = vector.load %arg2[%c0, %c0_0] : memref<160x128xbf16, #tpu.memory_space<vmem>>, vector<160x128xbf16>
    %c0_1 = arith.constant 0 : index
    %c0_2 = arith.constant 0 : index
    %c0_3 = arith.constant 0 : index
    %1 = vector.load %arg1[%c0_1, %c0_2, %c0_3] : memref<4x32x160xbf16, #tpu.memory_space<vmem>>, vector<1x32x160xbf16>
    %2 = vector.shape_cast %1 : vector<1x32x160xbf16> to vector<32x160xbf16>
    %cst = arith.constant dense<0.000000e+00> : vector<32x128xf32>
    %3 = tpu.matmul %2, %0, %cst {dimension_numbers = #tpu.dot_dimension_numbers<[1], [0], [0], [1], [0, 0, 1, 1], [], []>} : vector<32x160xbf16>, vector<160x128xbf16>, vector<32x128xf32> -> vector<32x128xf32>
    %c1 = arith.constant 1 : index
    %c0_4 = arith.constant 0 : index
    %c0_5 = arith.constant 0 : index
    %4 = vector.load %arg1[%c1, %c0_4, %c0_5] : memref<4x32x160xbf16, #tpu.memory_space<vmem>>, vector<1x32x160xbf16>
    %5 = vector.shape_cast %4 : vector<1x32x160xbf16> to vector<32x160xbf16>
    %cst_6 = arith.constant dense<0.000000e+00> : vector<32x128xf32>
    %6 = tpu.matmul %5, %0, %cst_6 {dimension_numbers = #tpu.dot_dimension_numbers<[1], [0], [0], [1], [0, 0, 1, 1], [], []>} : vector<32x160xbf16>, vector<160x128xbf16>, vector<32x128xf32> -> vector<32x128xf32>
    %7 = arith.maximumf %3, %6 : vector<32x128xf32>
    %c2 = arith.constant 2 : index
    %c0_7 = arith.constant 0 : index
    %c0_8 = arith.constant 0 : index
    %8 = vector.load %arg1[%c2, %c0_7, %c0_8] : memref<4x32x160xbf16, #tpu.memory_space<vmem>>, vector<1x32x160xbf16>
    %9 = vector.shape_cast %8 : vector<1x32x160xbf16> to vector<32x160xbf16>
    %cst_9 = arith.constant dense<0.000000e+00> : vector<32x128xf32>
    %10 = tpu.matmul %9, %0, %cst_9 {dimension_numbers = #tpu.dot_dimension_numbers<[1], [0], [0], [1], [0, 0, 1, 1], [], []>} : vector<32x160xbf16>, vector<160x128xbf16>, vector<32x128xf32> -> vector<32x128xf32>
    %11 = arith.maximumf %7, %10 : vector<32x128xf32>
    %c3 = arith.constant 3 : index
    %c0_10 = arith.constant 0 : index
    %c0_11 = arith.constant 0 : index
    %12 = vector.load %arg1[%c3, %c0_10, %c0_11] : memref<4x32x160xbf16, #tpu.memory_space<vmem>>, vector<1x32x160xbf16>
    %13 = vector.shape_cast %12 : vector<1x32x160xbf16> to vector<32x160xbf16>
    %cst_12 = arith.constant dense<0.000000e+00> : vector<32x128xf32>
    %14 = tpu.matmul %13, %0, %cst_12 {dimension_numbers = #tpu.dot_dimension_numbers<[1], [0], [0], [1], [0, 0, 1, 1], [], []>} : vector<32x160xbf16>, vector<160x128xbf16>, vector<32x128xf32> -> vector<32x128xf32>
    %15 = arith.maximumf %11, %14 : vector<32x128xf32>
    %c0_13 = arith.constant 0 : index
    %c0_14 = arith.constant 0 : index
    %16 = vector.load %arg3[%c0_13, %c0_14] : memref<1x128xf32, #tpu.memory_space<vmem>>, vector<1x128xf32>
    %17 = vector.broadcast %16 : vector<1x128xf32> to vector<32x128xf32>
    %18 = arith.addf %15, %17 : vector<32x128xf32>
    %cst_15 = arith.constant 0.000000e+00 : f32
    %19 = vector.broadcast %cst_15 : f32 to vector<32x128xf32>
    %20 = arith.maximumf %18, %19 : vector<32x128xf32>
    %21 = arith.truncf %20 : vector<32x128xf32> to vector<32x128xbf16>
    %c0_16 = arith.constant 0 : index
    %c0_17 = arith.constant 0 : index
    %22 = vector.load %arg4[%c0_16, %c0_17] : memref<32x128xbf16, #tpu.memory_space<vmem>>, vector<32x128xbf16>
    tpu.vector_store %arg4[%c0_16, %c0_17], %21 {strides = array<i32>} : memref<32x128xbf16, #tpu.memory_space<vmem>>, vector<32x128xbf16>,
    return
  }
  func.func @transform_0(%arg0: i32) -> (i32, i32, i32) {
    %c0_i32 = arith.constant 0 : i32
    %c0_i32_0 = arith.constant 0 : i32
    %c0_i32_1 = arith.constant 0 : i32
    return %c0_i32, %arg0, %c0_i32_0 : i32, i32, i32
  }
  func.func @transform_1(%arg0: i32) -> (i32, i32) {
    %c0_i32 = arith.constant 0 : i32
    %c0_i32_0 = arith.constant 0 : i32
    %c0_i32_1 = arith.constant 0 : i32
    return %c0_i32, %c0_i32_0 : i32, i32
  }
  func.func @transform_2(%arg0: i32) -> (i32, i32) {
    %c0_i32 = arith.constant 0 : i32
    %c0_i32_0 = arith.constant 0 : i32
    %c0_i32_1 = arith.constant 0 : i32
    return %c0_i32, %c0_i32_0 : i32, i32
  }
  func.func @transform_3(%arg0: i32) -> (i32, i32) {
    %c0_i32 = arith.constant 0 : i32
    %c0_i32_0 = arith.constant 0 : i32
    return %arg0, %c0_i32 : i32, i32
  }
}

module attributes {stable_mosaic.version = 11 : i64} {
  func.func @_fc_stack_kernel(%arg0: i32, %arg1: memref<16x512xbf16, #tpu.memory_space<vmem>>, %arg2: memref<512x128xbf16, #tpu.memory_space<vmem>>, %arg3: memref<1x128xf32, #tpu.memory_space<vmem>>, %arg4: memref<128x128xbf16, #tpu.memory_space<vmem>>, %arg5: memref<1x128xf32, #tpu.memory_space<vmem>>, %arg6: memref<128x128xbf16, #tpu.memory_space<vmem>>, %arg7: memref<1x128xf32, #tpu.memory_space<vmem>>, %arg8: memref<128x128xbf16, #tpu.memory_space<vmem>>, %arg9: memref<1x128xf32, #tpu.memory_space<vmem>>, %arg10: memref<16x128xf32, #tpu.memory_space<vmem>>) attributes {dimension_semantics = [#tpu.dimension_semantics<parallel>], iteration_bounds = array<i64: 1>, scalar_prefetch = 0 : i64, scratch_operands = 0 : i64, tpu.core_type = #tpu.core_type<tc>, window_params = [{transform_indices = @transform_0, window_bounds = array<i64: 16, 512>}, {pipeline_mode = #tpu.pipeline_mode<synchronous>, transform_indices = @transform_1, window_bounds = array<i64: 512, 128>}, {pipeline_mode = #tpu.pipeline_mode<synchronous>, transform_indices = @transform_2, window_bounds = array<i64: 1, 128>}, {pipeline_mode = #tpu.pipeline_mode<synchronous>, transform_indices = @transform_3, window_bounds = array<i64: 128, 128>}, {pipeline_mode = #tpu.pipeline_mode<synchronous>, transform_indices = @transform_4, window_bounds = array<i64: 1, 128>}, {pipeline_mode = #tpu.pipeline_mode<synchronous>, transform_indices = @transform_5, window_bounds = array<i64: 128, 128>}, {pipeline_mode = #tpu.pipeline_mode<synchronous>, transform_indices = @transform_6, window_bounds = array<i64: 1, 128>}, {pipeline_mode = #tpu.pipeline_mode<synchronous>, transform_indices = @transform_7, window_bounds = array<i64: 128, 128>}, {pipeline_mode = #tpu.pipeline_mode<synchronous>, transform_indices = @transform_8, window_bounds = array<i64: 1, 128>}, {transform_indices = @transform_9, window_bounds = array<i64: 16, 128>}]} {
    %c0 = arith.constant 0 : index
    %c0_0 = arith.constant 0 : index
    %0 = vector.load %arg1[%c0, %c0_0] : memref<16x512xbf16, #tpu.memory_space<vmem>>, vector<16x512xbf16>
    %c0_1 = arith.constant 0 : index
    %c0_2 = arith.constant 0 : index
    %1 = vector.load %arg2[%c0_1, %c0_2] : memref<512x128xbf16, #tpu.memory_space<vmem>>, vector<512x128xbf16>
    %cst = arith.constant dense<0.000000e+00> : vector<16x128xf32>
    %2 = tpu.matmul %0, %1, %cst {dimension_numbers = #tpu.dot_dimension_numbers<[1], [0], [0], [1], [0, 0, 1, 1], [], []>} : vector<16x512xbf16>, vector<512x128xbf16>, vector<16x128xf32> -> vector<16x128xf32>
    %c0_3 = arith.constant 0 : index
    %c0_4 = arith.constant 0 : index
    %3 = vector.load %arg3[%c0_3, %c0_4] : memref<1x128xf32, #tpu.memory_space<vmem>>, vector<1x128xf32>
    %4 = vector.broadcast %3 : vector<1x128xf32> to vector<16x128xf32>
    %5 = arith.addf %2, %4 : vector<16x128xf32>
    %cst_5 = arith.constant 0.000000e+00 : f32
    %6 = vector.broadcast %cst_5 : f32 to vector<16x128xf32>
    %7 = arith.maximumf %5, %6 : vector<16x128xf32>
    %8 = arith.truncf %7 : vector<16x128xf32> to vector<16x128xbf16>
    %c0_6 = arith.constant 0 : index
    %c0_7 = arith.constant 0 : index
    %9 = vector.load %arg4[%c0_6, %c0_7] : memref<128x128xbf16, #tpu.memory_space<vmem>>, vector<128x128xbf16>
    %cst_8 = arith.constant dense<0.000000e+00> : vector<16x128xf32>
    %10 = tpu.matmul %8, %9, %cst_8 {dimension_numbers = #tpu.dot_dimension_numbers<[1], [0], [0], [1], [0, 0, 1, 1], [], []>} : vector<16x128xbf16>, vector<128x128xbf16>, vector<16x128xf32> -> vector<16x128xf32>
    %c0_9 = arith.constant 0 : index
    %c0_10 = arith.constant 0 : index
    %11 = vector.load %arg5[%c0_9, %c0_10] : memref<1x128xf32, #tpu.memory_space<vmem>>, vector<1x128xf32>
    %12 = vector.broadcast %11 : vector<1x128xf32> to vector<16x128xf32>
    %13 = arith.addf %10, %12 : vector<16x128xf32>
    %cst_11 = arith.constant 0.000000e+00 : f32
    %14 = vector.broadcast %cst_11 : f32 to vector<16x128xf32>
    %15 = arith.maximumf %13, %14 : vector<16x128xf32>
    %16 = arith.truncf %15 : vector<16x128xf32> to vector<16x128xbf16>
    %c0_12 = arith.constant 0 : index
    %c0_13 = arith.constant 0 : index
    %17 = vector.load %arg6[%c0_12, %c0_13] : memref<128x128xbf16, #tpu.memory_space<vmem>>, vector<128x128xbf16>
    %cst_14 = arith.constant dense<0.000000e+00> : vector<16x128xf32>
    %18 = tpu.matmul %16, %17, %cst_14 {dimension_numbers = #tpu.dot_dimension_numbers<[1], [0], [0], [1], [0, 0, 1, 1], [], []>} : vector<16x128xbf16>, vector<128x128xbf16>, vector<16x128xf32> -> vector<16x128xf32>
    %c0_15 = arith.constant 0 : index
    %c0_16 = arith.constant 0 : index
    %19 = vector.load %arg7[%c0_15, %c0_16] : memref<1x128xf32, #tpu.memory_space<vmem>>, vector<1x128xf32>
    %20 = vector.broadcast %19 : vector<1x128xf32> to vector<16x128xf32>
    %21 = arith.addf %18, %20 : vector<16x128xf32>
    %cst_17 = arith.constant 0.000000e+00 : f32
    %22 = vector.broadcast %cst_17 : f32 to vector<16x128xf32>
    %23 = arith.maximumf %21, %22 : vector<16x128xf32>
    %24 = arith.truncf %23 : vector<16x128xf32> to vector<16x128xbf16>
    %c0_18 = arith.constant 0 : index
    %c0_19 = arith.constant 0 : index
    %25 = vector.load %arg8[%c0_18, %c0_19] : memref<128x128xbf16, #tpu.memory_space<vmem>>, vector<128x128xbf16>
    %cst_20 = arith.constant dense<0.000000e+00> : vector<16x128xf32>
    %26 = tpu.matmul %24, %25, %cst_20 {dimension_numbers = #tpu.dot_dimension_numbers<[1], [0], [0], [1], [0, 0, 1, 1], [], []>} : vector<16x128xbf16>, vector<128x128xbf16>, vector<16x128xf32> -> vector<16x128xf32>
    %c0_21 = arith.constant 0 : index
    %c0_22 = arith.constant 0 : index
    %27 = vector.load %arg9[%c0_21, %c0_22] : memref<1x128xf32, #tpu.memory_space<vmem>>, vector<1x128xf32>
    %28 = vector.broadcast %27 : vector<1x128xf32> to vector<16x128xf32>
    %29 = arith.addf %26, %28 : vector<16x128xf32>
    %c0_23 = arith.constant 0 : index
    %c0_24 = arith.constant 0 : index
    %30 = vector.load %arg10[%c0_23, %c0_24] : memref<16x128xf32, #tpu.memory_space<vmem>>, vector<16x128xf32>
    tpu.vector_store %arg10[%c0_23, %c0_24], %29 {strides = array<i32>} : memref<16x128xf32, #tpu.memory_space<vmem>>, vector<16x128xf32>,
    return
  }
  func.func @transform_0(%arg0: i32) -> (i32, i32) {
    %c0_i32 = arith.constant 0 : i32
    %c0_i32_0 = arith.constant 0 : i32
    return %arg0, %c0_i32 : i32, i32
  }
  func.func @transform_1(%arg0: i32) -> (i32, i32) {
    %c0_i32 = arith.constant 0 : i32
    %c0_i32_0 = arith.constant 0 : i32
    %c0_i32_1 = arith.constant 0 : i32
    return %c0_i32, %c0_i32_0 : i32, i32
  }
  func.func @transform_2(%arg0: i32) -> (i32, i32) {
    %c0_i32 = arith.constant 0 : i32
    %c0_i32_0 = arith.constant 0 : i32
    %c0_i32_1 = arith.constant 0 : i32
    return %c0_i32, %c0_i32_0 : i32, i32
  }
  func.func @transform_3(%arg0: i32) -> (i32, i32) {
    %c0_i32 = arith.constant 0 : i32
    %c0_i32_0 = arith.constant 0 : i32
    %c0_i32_1 = arith.constant 0 : i32
    return %c0_i32, %c0_i32_0 : i32, i32
  }
  func.func @transform_4(%arg0: i32) -> (i32, i32) {
    %c0_i32 = arith.constant 0 : i32
    %c0_i32_0 = arith.constant 0 : i32
    %c0_i32_1 = arith.constant 0 : i32
    return %c0_i32, %c0_i32_0 : i32, i32
  }
  func.func @transform_5(%arg0: i32) -> (i32, i32) {
    %c0_i32 = arith.constant 0 : i32
    %c0_i32_0 = arith.constant 0 : i32
    %c0_i32_1 = arith.constant 0 : i32
    return %c0_i32, %c0_i32_0 : i32, i32
  }
  func.func @transform_6(%arg0: i32) -> (i32, i32) {
    %c0_i32 = arith.constant 0 : i32
    %c0_i32_0 = arith.constant 0 : i32
    %c0_i32_1 = arith.constant 0 : i32
    return %c0_i32, %c0_i32_0 : i32, i32
  }
  func.func @transform_7(%arg0: i32) -> (i32, i32) {
    %c0_i32 = arith.constant 0 : i32
    %c0_i32_0 = arith.constant 0 : i32
    %c0_i32_1 = arith.constant 0 : i32
    return %c0_i32, %c0_i32_0 : i32, i32
  }
  func.func @transform_8(%arg0: i32) -> (i32, i32) {
    %c0_i32 = arith.constant 0 : i32
    %c0_i32_0 = arith.constant 0 : i32
    %c0_i32_1 = arith.constant 0 : i32
    return %c0_i32, %c0_i32_0 : i32, i32
  }
  func.func @transform_9(%arg0: i32) -> (i32, i32) {
    %c0_i32 = arith.constant 0 : i32
    %c0_i32_0 = arith.constant 0 : i32
    return %arg0, %c0_i32 : i32, i32
  }
}

</mosaic_0001>

<bundles_post_ra>
// kernel: net_forward.3
= control target key start
LH: loop header
LB: loop body
LE: loop exit
PB: predicated region body
PF: predicated region fallthrough
CT: control target
= control target key end

     0   :  { %s2847_s12 = smov 0   ;;  %s2849_s13 = smov 0   ;;  %s3532_s0 = inlined_call_operand.vmem [shape: bf16[4,416,80], index: 0, kind: input, shape index: {}]   ;;  %s3533_s1 = inlined_call_operand.vmem [shape: bf16[80,128], index: 1, kind: input, shape index: {}]   ;;  %s3534_s2 = inlined_call_operand.vmem [shape: f32[1,128], index: 2, kind: input, shape index: {}]   ;;  %s3535_s3 = inlined_call_operand.vmem [shape: bf16[416,128], index: 3, kind: output, shape index: {}]  }
   0x1   :  { %s2851_s14 = smov 0  }
   0x2 LB: > { %s2069_s15 = sadd.s32 4294967295, %s2823_s14   ;;  %s2864_s16 = sadd.s32 1, %s2823_s14   ;;  %s2823_s14 = sphi %s2851_s14, %s3574_s14   ;;  %s2819_s13 = sphi %s2849_s13, %s3573_s13   ;;  %s2815_s12 = sphi %s2847_s12, %s3572_s12  }
   0x3   : > { %s17_s17 = ssub.s32 %s2823_s14, %s2864_s16  ;;  %s20_s18 = sadd.s32 1, %s2819_s13 }
   0x4   : > { %p18_p0 = scmp.eq.s32.totalorder %s17_s17, 0  ;;  %p27_p1 = scmp.ne.s32.totalorder %s2819_s13, %s2815_s12 }
   0x5   : > { %p28_p2 = scmp.eq.s32.totalorder %s2823_s14, 0  ;;  %p2072_p4 = scmp.ge.s32.totalorder %s2823_s14, 2 }
   0x6   : > { %s2873_s19 = scalar_select %p18_p0, %s2819_s13, %s20_s18  }
   0x7   : > { %p29_p3 = por %p28_p2, %p27_p1  ;;  %127 = sbr.rel (%p2072_p4) target bundleno = 45 (0x2d), region = 24 }
   0xe   : > { %130 = sbr.rel (!%p29_p3) target bundleno = 45 (0x2d), region = 28  ;;  %s132_s20 = sand.u32 (%p29_p3), 1, %s2819_s13  }
   0xf   : > { %s2292_s21 = smul.u32 (%p29_p3), 104, %s2823_s14 }
  0x10   : > { %s2716_s22 = smul.u32 (%p29_p3), 416, %s132_s20 }
  0x11   : > { %s2881_s25 = scalar_lea.vmem (%p29_p3), %s3532_s0, %s2292_s21 }
  0x12   : > { %v153_v0 = vld [vmem:[%s2881_s25] sm:$0xff] (%p29_p3)   ;;  %v157_v1 = vld [vmem:[%s2881_s25 + $0x8] sm:$0xff] (%p29_p3)   ;;  %v161_v2 = vld [vmem:[%s2881_s25 + $0x10] sm:$0xff] (%p29_p3)   ;;  %s2886_s26 = scalar_lea.vmem (%p29_p3), [#allocation2], %s2716_s22 }
  0x13   : > { %154 = vst [vmem:[%s2886_s26] sm:$0xff] (%p29_p3), %v153_v0   ;;  %158 = vst [vmem:[%s2886_s26 + $0x8] sm:$0xff] (%p29_p3), %v157_v1   ;;  %v165_v3 = vld [vmem:[%s2881_s25 + $0x18] sm:$0xff] (%p29_p3)   ;;  %v169_v4 = vld [vmem:[%s2881_s25 + $0x20] sm:$0xff] (%p29_p3)  }
  0x14   : > { %162 = vst [vmem:[%s2886_s26 + $0x10] sm:$0xff] (%p29_p3), %v161_v2   ;;  %v173_v5 = vld [vmem:[%s2881_s25 + $0x28] sm:$0xff] (%p29_p3)   ;;  %166 = vst [vmem:[%s2886_s26 + $0x18] sm:$0xff] (%p29_p3), %v165_v3   ;;  %v177_v6 = vld [vmem:[%s2881_s25 + $0x30] sm:$0xff] (%p29_p3)  }
  0x15   : > { %170 = vst [vmem:[%s2886_s26 + $0x20] sm:$0xff] %v169_v4   ;;  %174 = vst [vmem:[%s2886_s26 + $0x28] sm:$0xff] %v173_v5   ;;  %v181_v7 = vld [vmem:[%s2881_s25 + $0x38] sm:$0xff]   ;;  %v185_v8 = vld [vmem:[%s2881_s25 + $0x40] sm:$0xff]  }
  0x16   : > { %178 = vst [vmem:[%s2886_s26 + $0x30] sm:$0xff] %v177_v6   ;;  %182 = vst [vmem:[%s2886_s26 + $0x38] sm:$0xff] %v181_v7   ;;  %v189_v9 = vld [vmem:[%s2881_s25 + $0x48] sm:$0xff]   ;;  %v193_v10 = vld [vmem:[%s2881_s25 + $0x50] sm:$0xff]  }
  0x17   : > { %186 = vst [vmem:[%s2886_s26 + $0x40] sm:$0xff] %v185_v8   ;;  %v197_v11 = vld [vmem:[%s2881_s25 + $0x58] sm:$0xff]   ;;  %190 = vst [vmem:[%s2886_s26 + $0x48] sm:$0xff] %v189_v9   ;;  %v201_v12 = vld [vmem:[%s2881_s25 + $0x60] sm:$0xff]  }
  0x18   : > { %194 = vst [vmem:[%s2886_s26 + $0x50] sm:$0xff] %v193_v10   ;;  %198 = vst [vmem:[%s2886_s26 + $0x58] sm:$0xff] %v197_v11   ;;  %v205_v13 = vld [vmem:[%s2881_s25 + $0xd0] sm:$0xff]   ;;  %v209_v14 = vld [vmem:[%s2881_s25 + $0xd8] sm:$0xff]  }
  0x19   : > { %202 = vst [vmem:[%s2886_s26 + $0x60] sm:$0xff] %v201_v12   ;;  %206 = vst [vmem:[%s2886_s26 + $0x68] sm:$0xff] %v205_v13   ;;  %v213_v15 = vld [vmem:[%s2881_s25 + $0xe0] sm:$0xff]   ;;  %v217_v16 = vld [vmem:[%s2881_s25 + $0xe8] sm:$0xff]  }
  0x1a   : > { %210 = vst [vmem:[%s2886_s26 + $0x70] sm:$0xff] %v209_v14   ;;  %v221_v17 = vld [vmem:[%s2881_s25 + $0xf0] sm:$0xff]   ;;  %214 = vst [vmem:[%s2886_s26 + $0x78] sm:$0xff] %v213_v15   ;;  %v225_v18 = vld [vmem:[%s2881_s25 + $0xf8] sm:$0xff]  }
  0x1b   : > { %218 = vst [vmem:[%s2886_s26 + $0x80] sm:$0xff] %v217_v16   ;;  %222 = vst [vmem:[%s2886_s26 + $0x88] sm:$0xff] %v221_v17   ;;  %v229_v19 = vld [vmem:[%s2881_s25 + $0x100] sm:$0xff]   ;;  %v233_v20 = vld [vmem:[%s2881_s25 + $0x108] sm:$0xff]  }
  0x1c   : > { %226 = vst [vmem:[%s2886_s26 + $0x90] sm:$0xff] %v225_v18   ;;  %230 = vst [vmem:[%s2886_s26 + $0x98] sm:$0xff] %v229_v19   ;;  %v237_v21 = vld [vmem:[%s2881_s25 + $0x110] sm:$0xff]   ;;  %v241_v22 = vld [vmem:[%s2881_s25 + $0x118] sm:$0xff]  }
  0x1d   : > { %234 = vst [vmem:[%s2886_s26 + $0xa0] sm:$0xff] %v233_v20   ;;  %v245_v23 = vld [vmem:[%s2881_s25 + $0x120] sm:$0xff]   ;;  %238 = vst [vmem:[%s2886_s26 + $0xa8] sm:$0xff] %v237_v21   ;;  %v249_v24 = vld [vmem:[%s2881_s25 + $0x128] sm:$0xff]  }
  0x1e   : > { %242 = vst [vmem:[%s2886_s26 + $0xb0] sm:$0xff] %v241_v22   ;;  %246 = vst [vmem:[%s2886_s26 + $0xb8] sm:$0xff] %v245_v23   ;;  %v253_v25 = vld [vmem:[%s2881_s25 + $0x130] sm:$0xff]   ;;  %v257_v26 = vld [vmem:[%s2881_s25 + $0x1a0] sm:$0xff]  }
  0x1f   : > { %250 = vst [vmem:[%s2886_s26 + $0xc0] sm:$0xff] %v249_v24   ;;  %254 = vst [vmem:[%s2886_s26 + $0xc8] sm:$0xff] %v253_v25   ;;  %v261_v27 = vld [vmem:[%s2881_s25 + $0x1a8] sm:$0xff]   ;;  %v265_v28 = vld [vmem:[%s2881_s25 + $0x1b0] sm:$0xff]  }
  0x20   : > { %258 = vst [vmem:[%s2886_s26 + $0xd0] sm:$0xff] %v257_v26   ;;  %v269_v29 = vld [vmem:[%s2881_s25 + $0x1b8] sm:$0xff]   ;;  %262 = vst [vmem:[%s2886_s26 + $0xd8] sm:$0xff] %v261_v27   ;;  %v273_v30 = vld [vmem:[%s2881_s25 + $0x1c0] sm:$0xff]  }
  0x21   : > { %266 = vst [vmem:[%s2886_s26 + $0xe0] sm:$0xff] %v265_v28   ;;  %270 = vst [vmem:[%s2886_s26 + $0xe8] sm:$0xff] %v269_v29   ;;  %v277_v31 = vld [vmem:[%s2881_s25 + $0x1c8] sm:$0xff]   ;;  %v281_v32 = vld [vmem:[%s2881_s25 + $0x1d0] sm:$0xff]  }
  0x22   : > { %274 = vst [vmem:[%s2886_s26 + $0xf0] sm:$0xff] %v273_v30   ;;  %278 = vst [vmem:[%s2886_s26 + $0xf8] sm:$0xff] %v277_v31   ;;  %v285_v33 = vld [vmem:[%s2881_s25 + $0x1d8] sm:$0xff]   ;;  %v289_v34 = vld [vmem:[%s2881_s25 + $0x1e0] sm:$0xff]  }
  0x23   : > { %282 = vst [vmem:[%s2886_s26 + $0x100] sm:$0xff] %v281_v32   ;;  %v293_v35 = vld [vmem:[%s2881_s25 + $0x1e8] sm:$0xff]   ;;  %286 = vst [vmem:[%s2886_s26 + $0x108] sm:$0xff] %v285_v33   ;;  %v297_v36 = vld [vmem:[%s2881_s25 + $0x1f0] sm:$0xff]  }
  0x24   : > { %290 = vst [vmem:[%s2886_s26 + $0x110] sm:$0xff] %v289_v34   ;;  %294 = vst [vmem:[%s2886_s26 + $0x118] sm:$0xff] %v293_v35   ;;  %v301_v37 = vld [vmem:[%s2881_s25 + $0x1f8] sm:$0xff]   ;;  %v305_v38 = vld [vmem:[%s2881_s25 + $0x200] sm:$0xff]  }
  0x25   : > { %298 = vst [vmem:[%s2886_s26 + $0x120] sm:$0xff] %v297_v36   ;;  %302 = vst [vmem:[%s2886_s26 + $0x128] sm:$0xff] %v301_v37   ;;  %v309_v39 = vld [vmem:[%s2881_s25 + $0x270] sm:$0xff]   ;;  %v313_v40 = vld [vmem:[%s2881_s25 + $0x278] sm:$0xff]  }
  0x26   : > { %306 = vst [vmem:[%s2886_s26 + $0x130] sm:$0xff] %v305_v38   ;;  %v317_v41 = vld [vmem:[%s2881_s25 + $0x280] sm:$0xff]   ;;  %310 = vst [vmem:[%s2886_s26 + $0x138] sm:$0xff] %v309_v39   ;;  %v321_v42 = vld [vmem:[%s2881_s25 + $0x288] sm:$0xff]  }
  0x27   : > { %314 = vst [vmem:[%s2886_s26 + $0x140] sm:$0xff] %v313_v40   ;;  %318 = vst [vmem:[%s2886_s26 + $0x148] sm:$0xff] %v317_v41   ;;  %v325_v43 = vld [vmem:[%s2881_s25 + $0x290] sm:$0xff]   ;;  %v329_v44 = vld [vmem:[%s2881_s25 + $0x298] sm:$0xff]  }
  0x28   : > { %322 = vst [vmem:[%s2886_s26 + $0x150] sm:$0xff] %v321_v42   ;;  %326 = vst [vmem:[%s2886_s26 + $0x158] sm:$0xff] %v325_v43   ;;  %v333_v45 = vld [vmem:[%s2881_s25 + $0x2a0] sm:$0xff]   ;;  %v337_v46 = vld [vmem:[%s2881_s25 + $0x2a8] sm:$0xff]  }
  0x29   : > { %330 = vst [vmem:[%s2886_s26 + $0x160] sm:$0xff] %v329_v44   ;;  %v341_v47 = vld [vmem:[%s2881_s25 + $0x2b0] sm:$0xff]   ;;  %334 = vst [vmem:[%s2886_s26 + $0x168] sm:$0xff] %v333_v45   ;;  %v345_v48 = vld [vmem:[%s2881_s25 + $0x2b8] sm:$0xff]  }
  0x2a   : > { %338 = vst [vmem:[%s2886_s26 + $0x170] sm:$0xff] %v337_v46   ;;  %342 = vst [vmem:[%s2886_s26 + $0x178] sm:$0xff] %v341_v47   ;;  %v349_v49 = vld [vmem:[%s2881_s25 + $0x2c0] sm:$0xff]   ;;  %v353_v50 = vld [vmem:[%s2881_s25 + $0x2c8] sm:$0xff]  }
  0x2b   : > { %346 = vst [vmem:[%s2886_s26 + $0x180] sm:$0xff] %v345_v48   ;;  %350 = vst [vmem:[%s2886_s26 + $0x188] sm:$0xff] %v349_v49   ;;  %v357_v51 = vld [vmem:[%s2881_s25 + $0x2d0] sm:$0xff]  }
  0x2c   : > { %354 = vst [vmem:[%s2886_s26 + $0x190] sm:$0xff] %v353_v50   ;;  %358 = vst [vmem:[%s2886_s26 + $0x198] sm:$0xff] %v357_v51  }
  0x2d PF: > { %p2074_p5 = scmp.ge.s32.totalorder %s2823_s14, 1  ;;  %p590_p6 = scmp.lt.s32.totalorder %s2823_s14, 3 }
  0x2f   : > { %p591_p7 = pnand %p2074_p5, %p590_p6 }
  0x31   : > { %594 = sbr.rel (%p591_p7) target bundleno = 502 (0x1f6), region = 69 }
  0x38   : > { %v2744_v52 = vld [vmem:[%s3533_s1] sm:$0xff]   ;;  %v2825_v53 = vmov 0.0   ;;  %v2745_v54 = vld [vmem:[%s3533_s1 + $0x8] sm:$0xff]   ;;  %s597_s4 = sand.u32 1, %s2815_s12   ;;  %vm2826_vm0 = vmmov 0   ;;  %v2746_v55 = vld [vmem:[%s3533_s1 + $0x10] sm:$0xff]  }
  0x39   : > { %2468 = vmatprep.subr.bf16.mxu0 %v2825_v53  ;;  %2530 = vmatprep.subr.bf16.mxu1 %v2825_v53  ;;  %s2717_s5 = smul.u32 416, %s597_s4  ;;  %v2747_v56 = vld [vmem:[%s3533_s1 + $0x18] sm:$0xff]   ;;  %v2748_v57 = vld [vmem:[%s3533_s1 + $0x20] sm:$0xff]   ;;  %vm759_vm1 = vcmask 654336  }
  0x3a   : > { %2469 = vmatpush3.bf16.msra.mxu0 %v2744_v52  ;;  %2531 = vmatpush3.bf16.msra.mxu1 %v2744_v52  ;;  %s621_s17 = smul.u32 26, %s2069_s15 }
  0x3b   : > { %2470 = vmatprep.subr.bf16.mxu0 %v2825_v53  ;;  %2532 = vmatprep.subr.bf16.mxu1 %v2825_v53  ;;  %s3009_s8 = scalar_lea.vmem [#allocation2], %s2717_s5 }
  0x3c   : > { %2478 = vmatprep.mubr.msk.bf16.mxu0 %vm2826_vm0, %v2825_v53  ;;  %2540 = vmatprep.mubr.msk.bf16.mxu1 %vm2826_vm0, %v2825_v53  ;;  %v2749_v58 = vld [vmem:[%s3009_s8] sm:$0xff]   ;;  %v2750_v59 = vld [vmem:[%s3009_s8 + $0x68] sm:$0xff]   ;;  %v2752_v61 = vld [vmem:[%s3009_s8 + $0x70] sm:$0xff]   ;;  %p622_p8 = scmp.lt.s32.totalorder %s621_s17, 51 }
  0x3d   : > { %v2751_v60 = vld [vmem:[%s3009_s8 + $0x8] sm:$0xff]   ;;  %v2753_v62 = vld [vmem:[%s3009_s8 + $0x10] sm:$0xff]   ;;  %v2754_v63 = vld [vmem:[%s3009_s8 + $0x78] sm:$0xff]  }
  0x3e   : > { %2471 = vmatpush3.bf16.msra.mxu0 %v2745_v54  ;;  %2533 = vmatpush3.bf16.msra.mxu1 %v2745_v54  ;;  %v2755_v0 = vld [vmem:[%s3009_s8 + $0x18] sm:$0xff]   ;;  %v2756_v1 = vld [vmem:[%s3009_s8 + $0x80] sm:$0xff]   ;;  %v2758_v3 = vld [vmem:[%s3009_s8 + $0x88] sm:$0xff]   ;;  %s3576_s17 = smov (!%p622_p8, %s621_s17), 51 }
  0x3f   : > { %2472 = vmatprep.subr.bf16.mxu0 %v2825_v53  ;;  %2534 = vmatprep.subr.bf16.mxu1 %v2825_v53  ;;  %v2757_v2 = vld [vmem:[%s3009_s8 + $0x20] sm:$0xff]   ;;  %v2759_v4 = vld [vmem:[%s3009_s8 + $0x28] sm:$0xff]   ;;  %v2760_v5 = vld [vmem:[%s3009_s8 + $0x90] sm:$0xff]   ;;  %s2075_s14 = sshll.u32 %s3576_s17, 2 }
  0x40   : > { %v2761_v6 = vld [vmem:[%s3009_s8 + $0x30] sm:$0xff]   ;;  %v2762_v7 = vld [vmem:[%s3009_s8 + $0x98] sm:$0xff]   ;;  %v2764_v9 = vld [vmem:[%s3009_s8 + $0xa0] sm:$0xff]   ;;  %s3414_s22 = scalar_lea.vmem %s3535_s3, %s2075_s14 }
  0x41   : > { %v2763_v8 = vld [vmem:[%s3009_s8 + $0x38] sm:$0xff]   ;;  %v2765_v10 = vld [vmem:[%s3009_s8 + $0x40] sm:$0xff]   ;;  %v2766_v11 = vld [vmem:[%s3009_s8 + $0xa8] sm:$0xff]  }
  0x42   : > { %2473 = vmatpush3.bf16.msra.mxu0 %v2746_v55  ;;  %2535 = vmatpush3.bf16.msra.mxu1 %v2746_v55  ;;  %v2767_v12 = vld [vmem:[%s3009_s8 + $0x48] sm:$0xff]   ;;  %v2768_v13 = vld [vmem:[%s3009_s8 + $0xb0] sm:$0xff]   ;;  %v2770_v15 = vld [vmem:[%s3009_s8 + $0xb8] sm:$0xff]  }
  0x43   : > { %2474 = vmatprep.subr.bf16.mxu0 %v2825_v53  ;;  %2536 = vmatprep.subr.bf16.mxu1 %v2825_v53  ;;  %v2769_v14 = vld [vmem:[%s3009_s8 + $0x50] sm:$0xff]   ;;  %v2771_v16 = vld [vmem:[%s3009_s8 + $0x58] sm:$0xff]   ;;  %v2772_v17 = vld [vmem:[%s3009_s8 + $0xc0] sm:$0xff]  }
  0x44   : > { %v2773_v18 = vld [vmem:[%s3009_s8 + $0x60] sm:$0xff]   ;;  %v2774_v19 = vld [vmem:[%s3009_s8 + $0xc8] sm:$0xff]   ;;  %v2775_v20 = vld [vmem:[%s3009_s8 + $0xd0] sm:$0xff]  }
  0x45   : > { %v2776_v21 = vld [vmem:[%s3009_s8 + $0x138] sm:$0xff]   ;;  %v2778_v23 = vld [vmem:[%s3009_s8 + $0x140] sm:$0xff]   ;;  %v2780_v25 = vld [vmem:[%s3009_s8 + $0x148] sm:$0xff]  }
  0x46   : > { %2475 = vmatpush3.bf16.msra.mxu0 %v2747_v56  ;;  %2537 = vmatpush3.bf16.msra.mxu1 %v2747_v56  ;;  %v2777_v22 = vld [vmem:[%s3009_s8 + $0xd8] sm:$0xff]   ;;  %v2779_v24 = vld [vmem:[%s3009_s8 + $0xe0] sm:$0xff]   ;;  %v2781_v26 = vld [vmem:[%s3009_s8 + $0xe8] sm:$0xff]  }
  0x47   : > { %2476 = vmatprep.subr.bf16.mxu0 %v2825_v53  ;;  %2538 = vmatprep.subr.bf16.mxu1 %v2825_v53  ;;  %v2782_v27 = vld [vmem:[%s3009_s8 + $0x150] sm:$0xff]   ;;  %v2784_v29 = vld [vmem:[%s3009_s8 + $0x158] sm:$0xff]   ;;  %v2786_v31 = vld [vmem:[%s3009_s8 + $0x160] sm:$0xff]  }
  0x48   : > { %v2783_v28 = vld [vmem:[%s3009_s8 + $0xf0] sm:$0xff]   ;;  %v2785_v30 = vld [vmem:[%s3009_s8 + $0xf8] sm:$0xff]   ;;  %v2787_v32 = vld [vmem:[%s3009_s8 + $0x100] sm:$0xff]  }
  0x49   : > { %v2788_v33 = vld [vmem:[%s3009_s8 + $0x168] sm:$0xff]   ;;  %v2790_v35 = vld [vmem:[%s3009_s8 + $0x170] sm:$0xff]   ;;  %v2792_v37 = vld [vmem:[%s3009_s8 + $0x178] sm:$0xff]  }
  0x4a   : > { %2477 = vmatpush3.bf16.msra.mxu0 %v2748_v57  ;;  %2539 = vmatpush3.bf16.msra.mxu1 %v2748_v57  ;;  %v2789_v34 = vld [vmem:[%s3009_s8 + $0x108] sm:$0xff]   ;;  %v2791_v36 = vld [vmem:[%s3009_s8 + $0x110] sm:$0xff]   ;;  %v2793_v38 = vld [vmem:[%s3009_s8 + $0x118] sm:$0xff]  }
  0x4b   : > { %2592 = vmatprep.subr.bf16.mxu0 %v2825_v53  ;;  %2654 = vmatprep.subr.bf16.mxu1 %v2825_v53  ;;  %v2794_v39 = vld [vmem:[%s3009_s8 + $0x180] sm:$0xff]   ;;  %v2796_v41 = vld [vmem:[%s3009_s8 + $0x188] sm:$0xff]   ;;  %v2798_v43 = vld [vmem:[%s3009_s8 + $0x190] sm:$0xff]  }
  0x4c   : > { %v2795_v40 = vld [vmem:[%s3009_s8 + $0x120] sm:$0xff]   ;;  %v2797_v42 = vld [vmem:[%s3009_s8 + $0x128] sm:$0xff]   ;;  %v2799_v44 = vld [vmem:[%s3009_s8 + $0x130] sm:$0xff]  }
  0x4d   : > { %2479 = vmatmul.mubr.msk.bf16.vlgmr.msra.gmra.mrb[0].mxu0 %vm759_vm1, %v2749_v58  ;;  %2541 = vmatmul.mubr.msk.bf16.vlgmr.msra.gmra.mrb[0].mxu1 %vm759_vm1, %v2750_v59  ;;  %v2800_v45 = vld [vmem:[%s3009_s8 + $0x198] sm:$0xff]  }
  0x4e   : > { %2593 = vmatpush3.bf16.msra.mxu0 %v2744_v52  ;;  %2655 = vmatpush3.bf16.msra.mxu1 %v2744_v52 }
  0x4f   : > { %2482 = vmatprep.mubr.msk.bf16.mxu0 %vm2826_vm0, %v2825_v53  ;;  %2544 = vmatprep.mubr.msk.bf16.mxu1 %vm2826_vm0, %v2825_v53 }
  0x50   : > { %2594 = vmatprep.subr.bf16.mxu0 %v2825_v53  ;;  %2656 = vmatprep.subr.bf16.mxu1 %v2825_v53 }
  0x52   : > { %2595 = vmatpush3.bf16.msra.mxu0 %v2745_v54  ;;  %2657 = vmatpush3.bf16.msra.mxu1 %v2745_v54 }
  0x53   : > { %2596 = vmatprep.subr.bf16.mxu0 %v2825_v53  ;;  %2658 = vmatprep.subr.bf16.mxu1 %v2825_v53 }
  0x55   : > { %2483 = vmatmul.mubr.msk.bf16.gmra.mrb[4].mxu0 %vm759_vm1, %v2751_v60  ;;  %2545 = vmatmul.mubr.msk.bf16.gmra.mrb[4].mxu1 %vm759_vm1, %v2752_v61 }
  0x56   : > { %2486 = vmatprep.mubr.msk.bf16.mxu0 %vm2826_vm0, %v2825_v53  ;;  %2548 = vmatprep.mubr.msk.bf16.mxu1 %vm2826_vm0, %v2825_v53 }
  0x57   : > { %2597 = vmatpush3.bf16.msra.mxu0 %v2746_v55  ;;  %2659 = vmatpush3.bf16.msra.mxu1 %v2746_v55 }
  0x58   : > { %2598 = vmatprep.subr.bf16.mxu0 %v2825_v53  ;;  %2660 = vmatprep.subr.bf16.mxu1 %v2825_v53 }
  0x5b   : > { %2599 = vmatpush3.bf16.msra.mxu0 %v2747_v56  ;;  %2661 = vmatpush3.bf16.msra.mxu1 %v2747_v56 }
  0x5c   : > { %2600 = vmatprep.subr.bf16.mxu0 %v2825_v53  ;;  %2662 = vmatprep.subr.bf16.mxu1 %v2825_v53 }
  0x5d   : > { %2487 = vmatmul.mubr.msk.bf16.gmra.mrb[8].mxu0 %vm759_vm1, %v2753_v62  ;;  %2549 = vmatmul.mubr.msk.bf16.gmra.mrb[8].mxu1 %vm759_vm1, %v2754_v63  ;;  %v3401_v63 = vld [vmem:[%s3534_s2] ss:$0 sm:$0xff] }
  0x5e   : > { %2490 = vmatprep.mubr.msk.bf16.mxu0 %vm2826_vm0, %v2825_v53  ;;  %2552 = vmatprep.mubr.msk.bf16.mxu1 %vm2826_vm0, %v2825_v53 }
  0x5f   : > { %2601 = vmatpush3.bf16.msra.mxu0 %v2748_v57  ;;  %2663 = vmatpush3.bf16.msra.mxu1 %v2748_v57 }
  0x65   : > { %2491 = vmatmul.mubr.msk.bf16.gmra.mrb[12].mxu0 %vm759_vm1, %v2755_v0  ;;  %2553 = vmatmul.mubr.msk.bf16.gmra.mrb[12].mxu1 %vm759_vm1, %v2756_v1 }
  0x66   : > { %2494 = vmatprep.mubr.msk.bf16.mxu0 %vm2826_vm0, %v2825_v53  ;;  %2556 = vmatprep.mubr.msk.bf16.mxu1 %vm2826_vm0, %v2825_v53 }
  0x6d   : > { %2495 = vmatmul.mubr.msk.bf16.gmra.mrb[16].mxu0 %vm759_vm1, %v2757_v2  ;;  %2557 = vmatmul.mubr.msk.bf16.gmra.mrb[16].mxu1 %vm759_vm1, %v2758_v3 }
  0x6e   : > { %2498 = vmatprep.mubr.msk.bf16.mxu0 %vm2826_vm0, %v2825_v53  ;;  %2560 = vmatprep.mubr.msk.bf16.mxu1 %vm2826_vm0, %v2825_v53 }
  0x75   : > { %2499 = vmatmul.mubr.msk.bf16.gmra.mrb[20].mxu0 %vm759_vm1, %v2759_v4  ;;  %2561 = vmatmul.mubr.msk.bf16.gmra.mrb[20].mxu1 %vm759_vm1, %v2760_v5 }
  0x76   : > { %2502 = vmatprep.mubr.msk.bf16.mxu0 %vm2826_vm0, %v2825_v53  ;;  %2564 = vmatprep.mubr.msk.bf16.mxu1 %vm2826_vm0, %v2825_v53 }
  0x7d   : > { %2503 = vmatmul.mubr.msk.bf16.gmra.mrb[24].mxu0 %vm759_vm1, %v2761_v6  ;;  %2565 = vmatmul.mubr.msk.bf16.gmra.mrb[24].mxu1 %vm759_vm1, %v2762_v7 }
  0x7e   : > { %2506 = vmatprep.mubr.msk.bf16.mxu0 %vm2826_vm0, %v2825_v53  ;;  %2568 = vmatprep.mubr.msk.bf16.mxu1 %vm2826_vm0, %v2825_v53 }
  0x85   : > { %2507 = vmatmul.mubr.msk.bf16.gmra.mrb[28].mxu0 %vm759_vm1, %v2763_v8  ;;  %2569 = vmatmul.mubr.msk.bf16.gmra.mrb[28].mxu1 %vm759_vm1, %v2764_v9 }
  0x86   : > { %2510 = vmatprep.mubr.msk.bf16.mxu0 %vm2826_vm0, %v2825_v53  ;;  %2572 = vmatprep.mubr.msk.bf16.mxu1 %vm2826_vm0, %v2825_v53 }
  0x8d   : > { %2511 = vmatmul.mubr.msk.bf16.gmra.mrb[32].mxu0 %vm759_vm1, %v2765_v10  ;;  %2573 = vmatmul.mubr.msk.bf16.gmra.mrb[32].mxu1 %vm759_vm1, %v2766_v11 }
  0x8e   : > { %2514 = vmatprep.mubr.msk.bf16.mxu0 %vm2826_vm0, %v2825_v53  ;;  %2576 = vmatprep.mubr.msk.bf16.mxu1 %vm2826_vm0, %v2825_v53 }
  0x95   : > { %2515 = vmatmul.mubr.msk.bf16.gmra.mrb[36].mxu0 %vm759_vm1, %v2767_v12  ;;  %2577 = vmatmul.mubr.msk.bf16.gmra.mrb[36].mxu1 %vm759_vm1, %v2768_v13 }
  0x96   : > { %2518 = vmatprep.mubr.msk.bf16.mxu0 %vm2826_vm0, %v2825_v53  ;;  %2580 = vmatprep.mubr.msk.bf16.mxu1 %vm2826_vm0, %v2825_v53 }
  0x9d   : > { %2519 = vmatmul.mubr.msk.bf16.gmra.mrb[40].mxu0 %vm759_vm1, %v2769_v14  ;;  %2581 = vmatmul.mubr.msk.bf16.gmra.mrb[40].mxu1 %vm759_vm1, %v2770_v15 }
  0x9e   : > { %2522 = vmatprep.mubr.msk.bf16.mxu0 %vm2826_vm0, %v2825_v53  ;;  %2584 = vmatprep.mubr.msk.bf16.mxu1 %vm2826_vm0, %v2825_v53 }
  0xa5   : > { %2523 = vmatmul.mubr.msk.bf16.gmra.mrb[44].mxu0 %vm759_vm1, %v2771_v16  ;;  %2585 = vmatmul.mubr.msk.bf16.gmra.mrb[44].mxu1 %vm759_vm1, %v2772_v17 }
  0xa6   : > { %2526 = vmatprep.mubr.msk.bf16.mxu0 %vm2826_vm0, %v2825_v53  ;;  %2588 = vmatprep.mubr.msk.bf16.mxu1 %vm2826_vm0, %v2825_v53 }
  0xad   : > { %2527 = vmatmul.mubr.msk.bf16.gmra.mrb[48].mxu0 %vm759_vm1, %v2773_v18  ;;  %2589 = vmatmul.mubr.msk.bf16.gmra.mrb[48].mxu1 %vm759_vm1, %v2774_v19 }
  0xae   : > { %2602 = vmatprep.mubr.msk.bf16.mxu0 %vm2826_vm0, %v2825_v53  ;;  %2664 = vmatprep.mubr.msk.bf16.mxu1 %vm2826_vm0, %v2825_v53 }
  0xb5   : > { %2603 = vmatmul.mubr.msk.bf16.vlgmr.msra.gmra.mrb[52].mxu0 %vm759_vm1, %v2775_v20  ;;  %2665 = vmatmul.mubr.msk.bf16.vlgmr.msra.gmra.mrb[52].mxu1 %vm759_vm1, %v2776_v21 }
  0xb6   : > { %2606 = vmatprep.mubr.msk.bf16.mxu0 %vm2826_vm0, %v2825_v53  ;;  %2668 = vmatprep.mubr.msk.bf16.mxu1 %vm2826_vm0, %v2825_v53 }
  0xbd   : > { %2607 = vmatmul.mubr.msk.bf16.gmra.mrb[56].mxu0 %vm759_vm1, %v2777_v22  ;;  %2669 = vmatmul.mubr.msk.bf16.gmra.mrb[56].mxu1 %vm759_vm1, %v2778_v23 }
  0xbe   : > { %2610 = vmatprep.mubr.msk.bf16.mxu0 %vm2826_vm0, %v2825_v53  ;;  %2672 = vmatprep.mubr.msk.bf16.mxu1 %vm2826_vm0, %v2825_v53 }
  0xc5   : > { %2611 = vmatmul.mubr.msk.bf16.gmra.mrb[60].mxu0 %vm759_vm1, %v2779_v24  ;;  %2673 = vmatmul.mubr.msk.bf16.gmra.mrb[60].mxu1 %vm759_vm1, %v2780_v25 }
  0xc6   : > { %2614 = vmatprep.mubr.msk.bf16.mxu0 %vm2826_vm0, %v2825_v53  ;;  %2676 = vmatprep.mubr.msk.bf16.mxu1 %vm2826_vm0, %v2825_v53 }
  0xcd   : > { %2615 = vmatmul.mubr.msk.bf16.gmra.mrb[64].mxu0 %vm759_vm1, %v2781_v26  ;;  %2677 = vmatmul.mubr.msk.bf16.gmra.mrb[64].mxu1 %vm759_vm1, %v2782_v27 }
  0xce   : > { %2618 = vmatprep.mubr.msk.bf16.mxu0 %vm2826_vm0, %v2825_v53  ;;  %2680 = vmatprep.mubr.msk.bf16.mxu1 %vm2826_vm0, %v2825_v53 }
  0xd5   : > { %2619 = vmatmul.mubr.msk.bf16.gmra.mrb[68].mxu0 %vm759_vm1, %v2783_v28  ;;  %2681 = vmatmul.mubr.msk.bf16.gmra.mrb[68].mxu1 %vm759_vm1, %v2784_v29 }
  0xd6   : > { %2622 = vmatprep.mubr.msk.bf16.mxu0 %vm2826_vm0, %v2825_v53  ;;  %2684 = vmatprep.mubr.msk.bf16.mxu1 %vm2826_vm0, %v2825_v53 }
  0xdd   : > { %2623 = vmatmul.mubr.msk.bf16.gmra.mrb[72].mxu0 %vm759_vm1, %v2785_v30  ;;  %2685 = vmatmul.mubr.msk.bf16.gmra.mrb[72].mxu1 %vm759_vm1, %v2786_v31 }
  0xde   : > { %2626 = vmatprep.mubr.msk.bf16.mxu0 %vm2826_vm0, %v2825_v53  ;;  %2688 = vmatprep.mubr.msk.bf16.mxu1 %vm2826_vm0, %v2825_v53 }
  0xe5   : > { %2627 = vmatmul.mubr.msk.bf16.gmra.mrb[76].mxu0 %vm759_vm1, %v2787_v32  ;;  %2689 = vmatmul.mubr.msk.bf16.gmra.mrb[76].mxu1 %vm759_vm1, %v2788_v33 }
  0xe6   : > { %2630 = vmatprep.mubr.msk.bf16.mxu0 %vm2826_vm0, %v2825_v53  ;;  %2692 = vmatprep.mubr.msk.bf16.mxu1 %vm2826_vm0, %v2825_v53 }
  0xed   : > { %2631 = vmatmul.mubr.msk.bf16.gmra.mrb[80].mxu0 %vm759_vm1, %v2789_v34  ;;  %2693 = vmatmul.mubr.msk.bf16.gmra.mrb[80].mxu1 %vm759_vm1, %v2790_v35 }
  0xee   : > { %2634 = vmatprep.mubr.msk.bf16.mxu0 %vm2826_vm0, %v2825_v53  ;;  %2696 = vmatprep.mubr.msk.bf16.mxu1 %vm2826_vm0, %v2825_v53 }
  0xf5   : > { %2635 = vmatmul.mubr.msk.bf16.gmra.mrb[84].mxu0 %vm759_vm1, %v2791_v36  ;;  %2697 = vmatmul.mubr.msk.bf16.gmra.mrb[84].mxu1 %vm759_vm1, %v2792_v37 }
  0xf6   : > { %2638 = vmatprep.mubr.msk.bf16.mxu0 %vm2826_vm0, %v2825_v53  ;;  %2700 = vmatprep.mubr.msk.bf16.mxu1 %vm2826_vm0, %v2825_v53 }
  0xfd   : > { %2639 = vmatmul.mubr.msk.bf16.gmra.mrb[88].mxu0 %vm759_vm1, %v2793_v38  ;;  %2701 = vmatmul.mubr.msk.bf16.gmra.mrb[88].mxu1 %vm759_vm1, %v2794_v39 }
  0xfe   : > { %2642 = vmatprep.mubr.msk.bf16.mxu0 %vm2826_vm0, %v2825_v53  ;;  %2704 = vmatprep.mubr.msk.bf16.mxu1 %vm2826_vm0, %v2825_v53 }
 0x105   : > { %2643 = vmatmul.mubr.msk.bf16.gmra.mrb[92].mxu0 %vm759_vm1, %v2795_v40  ;;  %2705 = vmatmul.mubr.msk.bf16.gmra.mrb[92].mxu1 %vm759_vm1, %v2796_v41 }
 0x106   : > { %2646 = vmatprep.mubr.msk.bf16.mxu0 %vm2826_vm0, %v2825_v53  ;;  %2708 = vmatprep.mubr.msk.bf16.mxu1 %vm2826_vm0, %v2825_v53 }
 0x10d   : > { %2647 = vmatmul.mubr.msk.bf16.gmra.mrb[96].mxu0 %vm759_vm1, %v2797_v42  ;;  %2709 = vmatmul.mubr.msk.bf16.gmra.mrb[96].mxu1 %vm759_vm1, %v2798_v43 }
 0x10e   : > { %2650 = vmatprep.mubr.msk.bf16.mxu0 %vm2826_vm0, %v2825_v53  ;;  %2712 = vmatprep.mubr.msk.bf16.mxu1 %vm2826_vm0, %v2825_v53 }
 0x115   : > { %2651 = vmatmul.mubr.msk.bf16.gmra.mrb[100].mxu0 %vm759_vm1, %v2799_v44  ;;  %2713 = vmatmul.mubr.msk.bf16.gmra.mrb[100].mxu1 %vm759_vm1, %v2800_v45 }
 0x120   : > { %v3237_v46 = vpop.f32.mrb[0].mxu0  ;;  %v3239_v47 = vpop.f32.mrb[0].mxu1 }
 0x121   : > { %v1204_v48 = vmax.f32 %v3237_v46, %v3239_v47  ;;  %v2480_v49 = vpop.f32.mrb[1].mxu0  ;;  %v2542_v50 = vpop.f32.mrb[1].mxu1 }
 0x122   : > { %v3243_v51 = vpop.f32.mrb[2].mxu0  ;;  %v3245_v52 = vpop.f32.mrb[2].mxu1 }
 0x123   : > { %v1205_v53 = vmax.f32 %v3243_v51, %v3245_v52  ;;  %v2481_v54 = vpop.f32.mrb[3].mxu0  ;;  %v2543_v55 = vpop.f32.mrb[3].mxu1 }
 0x128   : > { %v3249_v56 = vpop.f32.mrb[4].mxu0  ;;  %v3251_v57 = vpop.f32.mrb[4].mxu1 }
 0x129   : > { %v2484_v59 = vpop.f32.mrb[5].mxu0  ;;  %v2546_v60 = vpop.f32.mrb[5].mxu1 }
 0x12a   : > { %v3255_v61 = vpop.f32.mrb[6].mxu0  ;;  %v3257_v62 = vpop.f32.mrb[6].mxu1 }
 0x12b   : > { %v2485_v0 = vpop.f32.mrb[7].mxu0  ;;  %v2547_v1 = vpop.f32.mrb[7].mxu1 }
 0x130   : > { %v3261_v2 = vpop.f32.mrb[8].mxu0  ;;  %v3263_v3 = vpop.f32.mrb[8].mxu1 }
 0x131   : > { %v2488_v5 = vpop.f32.mrb[9].mxu0  ;;  %v2550_v6 = vpop.f32.mrb[9].mxu1 }
 0x132   : > { %v3267_v7 = vpop.f32.mrb[10].mxu0  ;;  %v3269_v8 = vpop.f32.mrb[10].mxu1 }
 0x133   : > { %v2489_v10 = vpop.f32.mrb[11].mxu0  ;;  %v2551_v11 = vpop.f32.mrb[11].mxu1 }
 0x138   : > { %v3273_v12 = vpop.f32.mrb[12].mxu0  ;;  %v3275_v13 = vpop.f32.mrb[12].mxu1 }
 0x139   : > { %v2492_v15 = vpop.f32.mrb[13].mxu0  ;;  %v2554_v16 = vpop.f32.mrb[13].mxu1 }
 0x13a   : > { %v3279_v17 = vpop.f32.mrb[14].mxu0  ;;  %v3281_v18 = vpop.f32.mrb[14].mxu1 }
 0x13b   : > { %v2493_v20 = vpop.f32.mrb[15].mxu0  ;;  %v2555_v21 = vpop.f32.mrb[15].mxu1 }
 0x140   : > { %v3285_v22 = vpop.f32.mrb[16].mxu0  ;;  %v3287_v23 = vpop.f32.mrb[16].mxu1 }
 0x141   : > { %v2496_v25 = vpop.f32.mrb[17].mxu0  ;;  %v2558_v26 = vpop.f32.mrb[17].mxu1 }
 0x142   : > { %v3291_v27 = vpop.f32.mrb[18].mxu0  ;;  %v3293_v28 = vpop.f32.mrb[18].mxu1 }
 0x143   : > { %v2497_v30 = vpop.f32.mrb[19].mxu0  ;;  %v2559_v31 = vpop.f32.mrb[19].mxu1 }
 0x148   : > { %v3297_v32 = vpop.f32.mrb[20].mxu0  ;;  %v3299_v33 = vpop.f32.mrb[20].mxu1 }
 0x149   : > { %v2500_v35 = vpop.f32.mrb[21].mxu0  ;;  %v2562_v36 = vpop.f32.mrb[21].mxu1 }
 0x14a   : > { %v3303_v37 = vpop.f32.mrb[22].mxu0  ;;  %v3305_v38 = vpop.f32.mrb[22].mxu1 }
 0x14b   : > { %v2501_v40 = vpop.f32.mrb[23].mxu0  ;;  %v2563_v41 = vpop.f32.mrb[23].mxu1 }
 0x150   : > { %v3309_v42 = vpop.f32.mrb[24].mxu0  ;;  %v3311_v43 = vpop.f32.mrb[24].mxu1 }
 0x151   : > { %v2504_v45 = vpop.f32.mrb[25].mxu0  ;;  %v2566_v49 = vpop.f32.mrb[25].mxu1 }
 0x152   : > { %v3315_v50 = vpop.f32.mrb[26].mxu0  ;;  %v3317_v54 = vpop.f32.mrb[26].mxu1 }
 0x153   : > { %v2505_v59 = vpop.f32.mrb[27].mxu0  ;;  %v2567_v60 = vpop.f32.mrb[27].mxu1 }
 0x158   : > { %v3321_v0 = vpop.f32.mrb[28].mxu0  ;;  %v3323_v1 = vpop.f32.mrb[28].mxu1 }
 0x159   : > { %v2508_v6 = vpop.f32.mrb[29].mxu0  ;;  %v2570_v10 = vpop.f32.mrb[29].mxu1 }
 0x15a   : > { %v3327_v11 = vpop.f32.mrb[30].mxu0  ;;  %v3329_v15 = vpop.f32.mrb[30].mxu1 }
 0x15b   : > { %v2509_v20 = vpop.f32.mrb[31].mxu0  ;;  %v2571_v21 = vpop.f32.mrb[31].mxu1 }
 0x160   : > { %v3333_v25 = vpop.f32.mrb[32].mxu0  ;;  %v3335_v26 = vpop.f32.mrb[32].mxu1 }
 0x161   : > { %v2512_v31 = vpop.f32.mrb[33].mxu0  ;;  %v2574_v35 = vpop.f32.mrb[33].mxu1 }
 0x162   : > { %v3339_v36 = vpop.f32.mrb[34].mxu0  ;;  %v3341_v40 = vpop.f32.mrb[34].mxu1 }
 0x163   : > { %v2513_v45 = vpop.f32.mrb[35].mxu0  ;;  %v2575_v49 = vpop.f32.mrb[35].mxu1 }
 0x168   : > { %v3345_v59 = vpop.f32.mrb[36].mxu0  ;;  %v3347_v60 = vpop.f32.mrb[36].mxu1 }
 0x169   : > { %v2516_v10 = vpop.f32.mrb[37].mxu0  ;;  %v2578_v20 = vpop.f32.mrb[37].mxu1 }
 0x16a   : > { %v3351_v21 = vpop.f32.mrb[38].mxu0  ;;  %v3353_v31 = vpop.f32.mrb[38].mxu1 }
 0x16b   : > { %v2517_v30 = vpop.f32.mrb[39].mxu0  ;;  %v2579_v41 = vpop.f32.mrb[39].mxu1 }
 0x170   : > { %v3357_v45 = vpop.f32.mrb[40].mxu0  ;;  %v3359_v49 = vpop.f32.mrb[40].mxu1 }
 0x171   : > { %v2520_v5 = vpop.f32.mrb[41].mxu0  ;;  %v2582_v6 = vpop.f32.mrb[41].mxu1 }
 0x172   : > { %v3363_v10 = vpop.f32.mrb[42].mxu0  ;;  %v3365_v20 = vpop.f32.mrb[42].mxu1 }
 0x173   : > { %v2521_v44 = vpop.f32.mrb[43].mxu0  ;;  %v2583_v35 = vpop.f32.mrb[43].mxu1 }
 0x178   : > { %v3369_v30 = vpop.f32.mrb[44].mxu0  ;;  %v3371_v41 = vpop.f32.mrb[44].mxu1 }
 0x179   : > { %v2524_v34 = vpop.f32.mrb[45].mxu0  ;;  %v2586_v16 = vpop.f32.mrb[45].mxu1 }
 0x17a   : > { %v3375_v5 = vpop.f32.mrb[46].mxu0  ;;  %v3377_v6 = vpop.f32.mrb[46].mxu1 }
 0x17b   : > { %v2525_v55 = vpop.f32.mrb[47].mxu0  ;;  %v2587_v44 = vpop.f32.mrb[47].mxu1 }
 0x180   : > { %v3381_v35 = vpop.f32.mrb[48].mxu0  ;;  %v3383_v24 = vpop.f32.mrb[48].mxu1 }
 0x181   : > { %3540 = vst [vmem:[#allocation3_spill] sm:$0xff] %v3381_v35  ;;  %3541 = vst [vmem:[#allocation4_spill] sm:$0xff] %v3383_v24  ;;  %v2528_v39 = vpop.f32.mrb[49].mxu0  ;;  %v2590_v34 = vpop.f32.mrb[49].mxu1 }
 0x182   : > { %v3387_v16 = vpop.f32.mrb[50].mxu0  ;;  %v3389_v14 = vpop.f32.mrb[50].mxu1 }
 0x183   : > { %3542 = vst [vmem:[#allocation5_spill] sm:$0xff] %v3387_v16  ;;  %3543 = vst [vmem:[#allocation6_spill] sm:$0xff] %v3389_v14  ;;  %v2529_v4 = vpop.f32.mrb[51].mxu0  ;;  %v2591_v29 = vpop.f32.mrb[51].mxu1 }
 0x188   : > { %v1395_v55 = vpop.f32.mrb[52].mxu0  ;;  %v1689_v44 = vpop.f32.mrb[52].mxu1 }
 0x189   : > { %v1498_v19 = vmax.f32 %v1204_v48, %v1395_v55  ;;  %v2604_v39 = vpop.f32.mrb[53].mxu0  ;;  %v2666_v34 = vpop.f32.mrb[53].mxu1 }
 0x18a   : > { %v1398_v58 = vpop.f32.mrb[54].mxu0  ;;  %v1692_v9 = vpop.f32.mrb[54].mxu1 }
 0x18b   : > { %v1792_v4 = vmax.f32 %v1498_v19, %v1689_v44  ;;  %v1499_v29 = vmax.f32 %v1205_v53, %v1398_v58  ;;  %v2605_v14 = vpop.f32.mrb[55].mxu0  ;;  %v2667_v16 = vpop.f32.mrb[55].mxu1  ;;  %v3544_v19 = vmax.f32 %v3249_v56, %v3251_v57 }
 0x18c   : > { %v3545_v14 = vmax.f32 %v3255_v61, %v3257_v62 }
 0x18d   : > { %v1825_v46 = vadd.f32 %v3401_v63, %v1792_v4  ;;  %v1793_v47 = vmax.f32 %v1499_v29, %v1692_v9 }
 0x18f   : > { %v1826_v48 = vadd.f32 %v3401_v63, %v1793_v47  ;;  %v1851_v34 = vmax.f32 %v1825_v46, 0.0 }
 0x190   : > { %v1403_v55 = vpop.f32.mrb[56].mxu0  ;;  %v1697_v39 = vpop.f32.mrb[56].mxu1 }
 0x191   : > { %v1852_v24 = vmax.f32 %v1826_v48, 0.0  ;;  %v1500_v44 = vmax.f32 %v3544_v19, %v1403_v55  ;;  %v2608_v35 = vpop.f32.mrb[57].mxu0  ;;  %v2670_v51 = vpop.f32.mrb[57].mxu1 }
 0x192   : > { %v1406_v52 = vpop.f32.mrb[58].mxu0  ;;  %v1700_v53 = vpop.f32.mrb[58].mxu1 }
 0x193   : > { %v2322_v58 = vpack.c.bf16 %v1852_v24, %v1851_v34  ;;  %v1794_v9 = vmax.f32 %v1500_v44, %v1697_v39  ;;  %v1501_v16 = vmax.f32 %v3545_v14, %v1406_v52  ;;  %v2609_v4 = vpop.f32.mrb[59].mxu0  ;;  %v2671_v29 = vpop.f32.mrb[59].mxu1  ;;  %v3546_v24 = vmax.f32 %v3261_v2, %v3263_v3 }
 0x194   : > { %v3547_v52 = vmax.f32 %v3267_v7, %v3269_v8 }
 0x195   : > { %2323 = vst [vmem:[%s3414_s22] sm:$0xff] %v2322_v58   ;;  %v1827_v56 = vadd.f32 %v3401_v63, %v1794_v9  ;;  %v1795_v57 = vmax.f32 %v1501_v16, %v1700_v53 }
 0x197   : > { %v1828_v35 = vadd.f32 %v3401_v63, %v1795_v57  ;;  %v1853_v48 = vmax.f32 %v1827_v56, 0.0  ;;  %v3548_v57 = vmax.f32 %v3273_v12, %v3275_v13 }
 0x198   : > { %v1411_v46 = vpop.f32.mrb[60].mxu0  ;;  %v1705_v47 = vpop.f32.mrb[60].mxu1 }
 0x199   : > { %v1854_v55 = vmax.f32 %v1828_v35, 0.0  ;;  %v1502_v39 = vmax.f32 %v3546_v24, %v1411_v46  ;;  %v2612_v34 = vpop.f32.mrb[61].mxu0  ;;  %v2674_v61 = vpop.f32.mrb[61].mxu1  ;;  %v3549_v24 = vmax.f32 %v3279_v17, %v3281_v18 }
 0x19a   : > { %v1414_v62 = vpop.f32.mrb[62].mxu0  ;;  %v1708_v19 = vpop.f32.mrb[62].mxu1 }
 0x19b   : > { %v2327_v44 = vpack.c.bf16 %v1854_v55, %v1853_v48  ;;  %v1796_v51 = vmax.f32 %v1502_v39, %v1705_v47  ;;  %v1503_v53 = vmax.f32 %v3547_v52, %v1414_v62  ;;  %v2613_v58 = vpop.f32.mrb[63].mxu0  ;;  %v2675_v9 = vpop.f32.mrb[63].mxu1 }
 0x19d   : > { %2384 = vst [vmem:[%s3414_s22 + $0x8] sm:$0xff] %v2327_v44   ;;  %v1829_v14 = vadd.f32 %v3401_v63, %v1796_v51  ;;  %v1797_v16 = vmax.f32 %v1503_v53, %v1708_v19  ;;  %v3550_v53 = vmax.f32 %v3285_v22, %v3287_v23 }
 0x19f   : > { %v1830_v2 = vadd.f32 %v3401_v63, %v1797_v16  ;;  %v1855_v29 = vmax.f32 %v1829_v14, 0.0 }
 0x1a0   : > { %v1419_v3 = vpop.f32.mrb[64].mxu0  ;;  %v1713_v4 = vpop.f32.mrb[64].mxu1 }
 0x1a1   : > { %v1856_v56 = vmax.f32 %v1830_v2, 0.0  ;;  %v1504_v35 = vmax.f32 %v3548_v57, %v1419_v3  ;;  %v2616_v46 = vpop.f32.mrb[65].mxu0  ;;  %v2678_v7 = vpop.f32.mrb[65].mxu1  ;;  %v3551_v3 = vmax.f32 %v3291_v27, %v3293_v28 }
 0x1a2   : > { %v1422_v8 = vpop.f32.mrb[66].mxu0  ;;  %v1716_v47 = vpop.f32.mrb[66].mxu1 }
 0x1a3   : > { %v2332_v48 = vpack.c.bf16 %v1856_v56, %v1855_v29  ;;  %v1798_v55 = vmax.f32 %v1504_v35, %v1713_v4  ;;  %v1505_v39 = vmax.f32 %v3549_v24, %v1422_v8  ;;  %v2617_v34 = vpop.f32.mrb[67].mxu0  ;;  %v2679_v61 = vpop.f32.mrb[67].mxu1 }
 0x1a4   : > { %v3553_v61 = vmax.f32 %v3303_v37, %v3305_v38 }
 0x1a5   : > { %2385 = vst [vmem:[%s3414_s22 + $0x10] sm:$0xff] %v2332_v48   ;;  %v1831_v62 = vadd.f32 %v3401_v63, %v1798_v55  ;;  %v1799_v19 = vmax.f32 %v1505_v39, %v1716_v47  ;;  %v3552_v47 = vmax.f32 %v3297_v32, %v3299_v33 }
 0x1a7   : > { %v1832_v12 = vadd.f32 %v3401_v63, %v1799_v19  ;;  %v1857_v51 = vmax.f32 %v1831_v62, 0.0 }
 0x1a8   : > { %v1427_v13 = vpop.f32.mrb[68].mxu0  ;;  %v1721_v44 = vpop.f32.mrb[68].mxu1 }
 0x1a9   : > { %v1858_v52 = vmax.f32 %v1832_v12, 0.0  ;;  %v1506_v58 = vmax.f32 %v3550_v53, %v1427_v13  ;;  %v2620_v9 = vpop.f32.mrb[69].mxu0  ;;  %v2682_v17 = vpop.f32.mrb[69].mxu1 }
 0x1aa   : > { %v1430_v18 = vpop.f32.mrb[70].mxu0  ;;  %v1724_v14 = vpop.f32.mrb[70].mxu1 }
 0x1ab   : > { %v2337_v16 = vpack.c.bf16 %v1858_v52, %v1857_v51  ;;  %v1800_v2 = vmax.f32 %v1506_v58, %v1721_v44  ;;  %v1507_v4 = vmax.f32 %v3551_v3, %v1430_v18  ;;  %v2621_v29 = vpop.f32.mrb[71].mxu0  ;;  %v2683_v56 = vpop.f32.mrb[71].mxu1  ;;  %v3554_v58 = vmax.f32 %v3309_v42, %v3311_v43 }
 0x1ad   : > { %2386 = vst [vmem:[%s3414_s22 + $0x18] sm:$0xff] %v2337_v16   ;;  %v1833_v57 = vadd.f32 %v3401_v63, %v1800_v2  ;;  %v1801_v35 = vmax.f32 %v1507_v4, %v1724_v14  ;;  %v3555_v2 = vmax.f32 %v3315_v50, %v3317_v54 }
 0x1af   : > { %v1834_v22 = vadd.f32 %v3401_v63, %v1801_v35  ;;  %v1859_v7 = vmax.f32 %v1833_v57, 0.0 }
 0x1b0   : > { %v1435_v23 = vpop.f32.mrb[72].mxu0  ;;  %v1729_v46 = vpop.f32.mrb[72].mxu1 }
 0x1b1   : > { %v1860_v8 = vmax.f32 %v1834_v22, 0.0  ;;  %v1508_v48 = vmax.f32 %v3552_v47, %v1435_v23  ;;  %v2624_v55 = vpop.f32.mrb[73].mxu0  ;;  %v2686_v27 = vpop.f32.mrb[73].mxu1 }
 0x1b2   : > { %v1438_v28 = vpop.f32.mrb[74].mxu0  ;;  %v1732_v24 = vpop.f32.mrb[74].mxu1  ;;  %v3557_v27 = vmax.f32 %v3327_v11, %v3329_v15 }
 0x1b3   : > { %v2342_v39 = vpack.c.bf16 %v1860_v8, %v1859_v7  ;;  %v1802_v34 = vmax.f32 %v1508_v48, %v1729_v46  ;;  %v1509_v62 = vmax.f32 %v3553_v61, %v1438_v28  ;;  %v2625_v19 = vpop.f32.mrb[75].mxu0  ;;  %v2687_v12 = vpop.f32.mrb[75].mxu1  ;;  %v3556_v46 = vmax.f32 %v3321_v0, %v3323_v1 }
 0x1b5   : > { %2387 = vst [vmem:[%s3414_s22 + $0x20] sm:$0xff] %v2342_v39   ;;  %v1835_v13 = vadd.f32 %v3401_v63, %v1802_v34  ;;  %v1803_v44 = vmax.f32 %v1509_v62, %v1732_v24 }
 0x1b7   : > { %v1836_v32 = vadd.f32 %v3401_v63, %v1803_v44  ;;  %v1861_v52 = vmax.f32 %v1835_v13, 0.0  ;;  %v3558_v13 = vmax.f32 %v3333_v25, %v3335_v26 }
 0x1b8   : > { %v1443_v33 = vpop.f32.mrb[76].mxu0  ;;  %v1737_v51 = vpop.f32.mrb[76].mxu1 }
 0x1b9   : > { %v1862_v53 = vmax.f32 %v1836_v32, 0.0  ;;  %v1510_v9 = vmax.f32 %v3554_v58, %v1443_v33  ;;  %v2628_v17 = vpop.f32.mrb[77].mxu0  ;;  %v2690_v37 = vpop.f32.mrb[77].mxu1 }
 0x1ba   : > { %v1446_v38 = vpop.f32.mrb[78].mxu0  ;;  %v1740_v18 = vpop.f32.mrb[78].mxu1 }
 0x1bb   : > { %v2347_v14 = vpack.c.bf16 %v1862_v53, %v1861_v52  ;;  %v1804_v16 = vmax.f32 %v1510_v9, %v1737_v51  ;;  %v1511_v3 = vmax.f32 %v3555_v2, %v1446_v38  ;;  %v2629_v4 = vpop.f32.mrb[79].mxu0  ;;  %v2691_v29 = vpop.f32.mrb[79].mxu1  ;;  %v3559_v53 = vmax.f32 %v3339_v36, %v3341_v40 }
 0x1bc   : > { %v3560_v2 = vmax.f32 %v3345_v59, %v3347_v60 }
 0x1bd   : > { %2388 = vst [vmem:[%s3414_s22 + $0x28] sm:$0xff] %v2347_v14   ;;  %v1837_v56 = vadd.f32 %v3401_v63, %v1804_v16  ;;  %v1805_v57 = vmax.f32 %v1511_v3, %v1740_v18 }
 0x1bf   : > { %v1838_v42 = vadd.f32 %v3401_v63, %v1805_v57  ;;  %v1863_v22 = vmax.f32 %v1837_v56, 0.0 }
 0x1c0   : > { %v1451_v43 = vpop.f32.mrb[80].mxu0  ;;  %v1745_v35 = vpop.f32.mrb[80].mxu1 }
 0x1c1   : > { %v1864_v23 = vmax.f32 %v1838_v42, 0.0  ;;  %v1512_v7 = vmax.f32 %v3556_v46, %v1451_v43  ;;  %v2632_v8 = vpop.f32.mrb[81].mxu0  ;;  %v2694_v50 = vpop.f32.mrb[81].mxu1  ;;  %v3561_v42 = vmax.f32 %v3351_v21, %v3353_v31 }
 0x1c2   : > { %v1454_v54 = vpop.f32.mrb[82].mxu0  ;;  %v1748_v47 = vpop.f32.mrb[82].mxu1 }
 0x1c3   : > { %v2352_v48 = vpack.c.bf16 %v1864_v23, %v1863_v22  ;;  %v1806_v55 = vmax.f32 %v1512_v7, %v1745_v35  ;;  %v1513_v28 = vmax.f32 %v3557_v27, %v1454_v54  ;;  %v2633_v24 = vpop.f32.mrb[83].mxu0  ;;  %v2695_v39 = vpop.f32.mrb[83].mxu1  ;;  %v3562_v54 = vmax.f32 %v3357_v45, %v3359_v49 }
 0x1c4   : > { %v3563_v24 = vmax.f32 %v3363_v10, %v3365_v20 }
 0x1c5   : > { %2389 = vst [vmem:[%s3414_s22 + $0x30] sm:$0xff] %v2352_v48   ;;  %v1839_v34 = vadd.f32 %v3401_v63, %v1806_v55  ;;  %v1807_v61 = vmax.f32 %v1513_v28, %v1748_v47 }
 0x1c7   : > { %v1840_v0 = vadd.f32 %v3401_v63, %v1807_v61  ;;  %v1865_v19 = vmax.f32 %v1839_v34, 0.0 }
 0x1c8   : > { %v1459_v1 = vpop.f32.mrb[84].mxu0  ;;  %v1753_v62 = vpop.f32.mrb[84].mxu1 }
 0x1c9   : > { %v1866_v12 = vmax.f32 %v1840_v0, 0.0  ;;  %v1514_v44 = vmax.f32 %v3558_v13, %v1459_v1  ;;  %v2636_v32 = vpop.f32.mrb[85].mxu0  ;;  %v2698_v11 = vpop.f32.mrb[85].mxu1  ;;  %v3564_v13 = vmax.f32 %v3369_v30, %v3371_v41 }
 0x1ca   : > { %v1462_v15 = vpop.f32.mrb[86].mxu0  ;;  %v1756_v33 = vpop.f32.mrb[86].mxu1 }
 0x1cb   : > { %v2357_v51 = vpack.c.bf16 %v1866_v12, %v1865_v19  ;;  %v1808_v52 = vmax.f32 %v1514_v44, %v1753_v62  ;;  %v1515_v58 = vmax.f32 %v3559_v53, %v1462_v15  ;;  %v2637_v9 = vpop.f32.mrb[87].mxu0  ;;  %v2699_v17 = vpop.f32.mrb[87].mxu1 }
 0x1cd   : > { %2390 = vst [vmem:[%s3414_s22 + $0x38] sm:$0xff] %v2357_v51   ;;  %v1841_v37 = vadd.f32 %v3401_v63, %v1808_v52  ;;  %v1809_v38 = vmax.f32 %v1515_v58, %v1756_v33  ;;  %v3565_v51 = vmax.f32 %v3375_v5, %v3377_v6 }
 0x1cf   : > { %v1842_v25 = vadd.f32 %v3401_v63, %v1809_v38  ;;  %v1867_v14 = vmax.f32 %v1841_v37, 0.0 }
 0x1d0   : > { %v1467_v26 = vpop.f32.mrb[88].mxu0  ;;  %v1761_v18 = vpop.f32.mrb[88].mxu1 }
 0x1d1   : > { %v1868_v16 = vmax.f32 %v1842_v25, 0.0  ;;  %v1516_v3 = vmax.f32 %v3560_v2, %v1467_v26  ;;  %v2640_v4 = vpop.f32.mrb[89].mxu0  ;;  %v2702_v36 = vpop.f32.mrb[89].mxu1  ;;  %v3566_v26 = vld [vmem:[#allocation3_spill] sm:$0xff] }
 0x1d2   : > { %v1470_v40 = vpop.f32.mrb[90].mxu0  ;;  %v1764_v29 = vpop.f32.mrb[90].mxu1 }
 0x1d3   : > { %v2362_v56 = vpack.c.bf16 %v1868_v16, %v1867_v14  ;;  %v1810_v57 = vmax.f32 %v1516_v3, %v1761_v18  ;;  %v1517_v43 = vmax.f32 %v3561_v42, %v1470_v40  ;;  %v2641_v35 = vpop.f32.mrb[91].mxu0  ;;  %v2703_v22 = vpop.f32.mrb[91].mxu1  ;;  %v3567_v18 = vld [vmem:[#allocation4_spill] sm:$0xff]  ;;  %v3569_v40 = vld [vmem:[#allocation5_spill] sm:$0xff] }
 0x1d4   : > { %v3568_v14 = vmax.f32 %v3566_v26, %v3567_v18 }
 0x1d5   : > { %2391 = vst [vmem:[%s3414_s22 + $0x40] sm:$0xff] %v2362_v56   ;;  %v1843_v23 = vadd.f32 %v3401_v63, %v1810_v57  ;;  %v1811_v46 = vmax.f32 %v1517_v43, %v1764_v29  ;;  %v3570_v29 = vld [vmem:[#allocation6_spill] sm:$0xff] }
 0x1d6   : > { %v3571_v56 = vmax.f32 %v3569_v40, %v3570_v29 }
 0x1d7   : > { %v1844_v59 = vadd.f32 %v3401_v63, %v1811_v46  ;;  %v1869_v8 = vmax.f32 %v1843_v23, 0.0 }
 0x1d8   : > { %v1475_v60 = vpop.f32.mrb[92].mxu0  ;;  %v1769_v7 = vpop.f32.mrb[92].mxu1 }
 0x1d9   : > { %v1870_v50 = vmax.f32 %v1844_v59, 0.0  ;;  %v1518_v47 = vmax.f32 %v3562_v54, %v1475_v60  ;;  %v2644_v48 = vpop.f32.mrb[93].mxu0  ;;  %v2706_v21 = vpop.f32.mrb[93].mxu1 }
 0x1da   : > { %v1478_v31 = vpop.f32.mrb[94].mxu0  ;;  %v1772_v55 = vpop.f32.mrb[94].mxu1 }
 0x1db   : > { %v2367_v27 = vpack.c.bf16 %v1870_v50, %v1869_v8  ;;  %v1812_v28 = vmax.f32 %v1518_v47, %v1769_v7  ;;  %v1519_v39 = vmax.f32 %v3563_v24, %v1478_v31  ;;  %v2645_v34 = vpop.f32.mrb[95].mxu0  ;;  %v2707_v61 = vpop.f32.mrb[95].mxu1 }
 0x1dd   : > { %2392 = vst [vmem:[%s3414_s22 + $0x48] sm:$0xff] %v2367_v27   ;;  %v1845_v0 = vadd.f32 %v3401_v63, %v1812_v28  ;;  %v1813_v1 = vmax.f32 %v1519_v39, %v1772_v55 }
 0x1df   : > { %v1846_v45 = vadd.f32 %v3401_v63, %v1813_v1  ;;  %v1871_v19 = vmax.f32 %v1845_v0, 0.0 }
 0x1e0   : > { %v1483_v49 = vpop.f32.mrb[96].mxu0  ;;  %v1777_v62 = vpop.f32.mrb[96].mxu1 }
 0x1e1   : > { %v1872_v12 = vmax.f32 %v1846_v45, 0.0  ;;  %v1520_v44 = vmax.f32 %v3564_v13, %v1483_v49  ;;  %v2648_v32 = vpop.f32.mrb[97].mxu0  ;;  %v2710_v10 = vpop.f32.mrb[97].mxu1 }
 0x1e2   : > { %v1486_v20 = vpop.f32.mrb[98].mxu0  ;;  %v1780_v11 = vpop.f32.mrb[98].mxu1 }
 0x1e3   : > { %v2372_v15 = vpack.c.bf16 %v1872_v12, %v1871_v19  ;;  %v1814_v33 = vmax.f32 %v1520_v44, %v1777_v62  ;;  %v1521_v52 = vmax.f32 %v3565_v51, %v1486_v20  ;;  %v2649_v53 = vpop.f32.mrb[99].mxu0  ;;  %v2711_v58 = vpop.f32.mrb[99].mxu1 }
 0x1e5   : > { %2393 = vst [vmem:[%s3414_s22 + $0x50] sm:$0xff] %v2372_v15   ;;  %v1847_v9 = vadd.f32 %v3401_v63, %v1814_v33  ;;  %v1815_v17 = vmax.f32 %v1521_v52, %v1780_v11 }
 0x1e7   : > { %v1848_v30 = vadd.f32 %v3401_v63, %v1815_v17  ;;  %v1873_v38 = vmax.f32 %v1847_v9, 0.0 }
 0x1e8   : > { %v1491_v41 = vpop.f32.mrb[100].mxu0  ;;  %v1785_v37 = vpop.f32.mrb[100].mxu1 }
 0x1e9   : > { %v1874_v25 = vmax.f32 %v1848_v30, 0.0  ;;  %v1522_v16 = vmax.f32 %v3568_v14, %v1491_v41  ;;  %v2652_v2 = vpop.f32.mrb[101].mxu0  ;;  %v2714_v5 = vpop.f32.mrb[101].mxu1 }
 0x1ea   : > { %v1494_v6 = vpop.f32.mrb[102].mxu0  ;;  %v1788_v3 = vpop.f32.mrb[102].mxu1 }
 0x1eb   : > { %v2377_v4 = vpack.c.bf16 %v1874_v25, %v1873_v38  ;;  %v1816_v36 = vmax.f32 %v1522_v16, %v1785_v37  ;;  %v1523_v57 = vmax.f32 %v3571_v56, %v1494_v6  ;;  %v2653_v42 = vpop.f32.mrb[103].mxu0  ;;  %v2715_v43 = vpop.f32.mrb[103].mxu1 }
 0x1ed   : > { %2394 = vst [vmem:[%s3414_s22 + $0x58] sm:$0xff] %v2377_v4   ;;  %v1849_v35 = vadd.f32 %v3401_v63, %v1816_v36  ;;  %v1817_v22 = vmax.f32 %v1523_v57, %v1788_v3 }
 0x1ef   : > { %v1850_v23 = vadd.f32 %v3401_v63, %v1817_v22  ;;  %v1875_v46 = vmax.f32 %v1849_v35, 0.0 }
 0x1f1   : > { %v1876_v59 = vmax.f32 %v1850_v23, 0.0 }
 0x1f3   : > { %v2382_v60 = vpack.c.bf16 %v1876_v59, %v1875_v46 }
 0x1f5   : > { %2395 = vst [vmem:[%s3414_s22 + $0x60] sm:$0xff] %v2382_v60  }
 0x1f6 PF: > { %p10_p9 = scmp.ge.s32.totalorder %s2864_s16, 4   ;;  %s3572_s12 = smov %s2819_s13 }
 0x1f7   : > { %s3573_s13 = smov %s2873_s19  ;;  %s3574_s14 = smov %s2864_s16 }
 0x1f8   :  { %12 = sbr.rel (!%p10_p9) target bundleno = 2 (0x2), region = 111 }

// kernel: net_forward.4
= control target key start
LH: loop header
LB: loop body
LE: loop exit
PB: predicated region body
PF: predicated region fallthrough
CT: control target
= control target key end

     0   :  { %s957_s12 = smov 0   ;;  %s959_s13 = smov 0   ;;  %s1162_s0 = inlined_call_operand.vmem [shape: bf16[4,64,160], index: 0, kind: input, shape index: {}]   ;;  %s1163_s1 = inlined_call_operand.vmem [shape: bf16[160,128], index: 1, kind: input, shape index: {}]   ;;  %s1164_s2 = inlined_call_operand.vmem [shape: f32[1,128], index: 2, kind: input, shape index: {}]   ;;  %s1165_s3 = inlined_call_operand.vmem [shape: bf16[64,128], index: 3, kind: output, shape index: {}]  }
   0x1   :  { %s961_s14 = smov 0  }
   0x2 LB: > { %s771_s15 = sadd.s32 4294967295, %s934_s14   ;;  %s974_s16 = sadd.s32 1, %s934_s14   ;;  %s934_s14 = sphi %s961_s14, %s1168_s14   ;;  %s930_s13 = sphi %s959_s13, %s1167_s13   ;;  %s926_s12 = sphi %s957_s12, %s1166_s12  }
   0x3   : > { %s17_s17 = ssub.s32 %s934_s14, %s974_s16  ;;  %s20_s18 = sadd.s32 1, %s930_s13 }
   0x4   : > { %p18_p0 = scmp.eq.s32.totalorder %s17_s17, 0  ;;  %p27_p1 = scmp.ne.s32.totalorder %s930_s13, %s926_s12 }
   0x5   : > { %p28_p2 = scmp.eq.s32.totalorder %s934_s14, 0  ;;  %p774_p4 = scmp.ge.s32.totalorder %s934_s14, 2 }
   0x6   : > { %s983_s19 = scalar_select %p18_p0, %s930_s13, %s20_s18  }
   0x7   : > { %p29_p3 = por %p28_p2, %p27_p1  ;;  %127 = sbr.rel (%p774_p4) target bundleno = 26 (0x1a), region = 24 }
   0xe   : > { %130 = sbr.rel (!%p29_p3) target bundleno = 26 (0x1a), region = 28  ;;  %s132_s20 = sand.u32 (%p29_p3), 1, %s930_s13  }
   0xf   : > { %s837_s21 = sshll.u32 (%p29_p3), %s934_s14, 5  ;;  %s775_s22 = sshll.u32 (%p29_p3), %s132_s20, 7 }
  0x10   : > { %s991_s25 = scalar_lea.vmem (%p29_p3), %s1162_s0, %s837_s21  ;;  %s134_s26 = scalar_lea.vmem (%p29_p3), [#allocation2], %s775_s22 }
  0x11   : > { %v196_v0 = vld [vmem:[%s991_s25] sm:$0xff] (%p29_p3)  ;;  %v198_v1 = vld [vmem:[%s991_s25 + $0x8] sm:$0xff] (%p29_p3)  ;;  %v200_v2 = vld [vmem:[%s991_s25 + $0x10] sm:$0xff] (%p29_p3) }
  0x12   : > { %197 = vst [vmem:[%s134_s26] sm:$0xff] (%p29_p3), %v196_v0  ;;  %199 = vst [vmem:[%s134_s26 + $0x8] sm:$0xff] (%p29_p3), %v198_v1  ;;  %v202_v3 = vld [vmem:[%s991_s25 + $0x18] sm:$0xff] (%p29_p3)  ;;  %v204_v4 = vld [vmem:[%s991_s25 + $0x40] sm:$0xff] (%p29_p3) }
  0x13   : > { %201 = vst [vmem:[%s134_s26 + $0x10] sm:$0xff] (%p29_p3), %v200_v2  ;;  %v206_v5 = vld [vmem:[%s991_s25 + $0x48] sm:$0xff] (%p29_p3)  ;;  %203 = vst [vmem:[%s134_s26 + $0x18] sm:$0xff] (%p29_p3), %v202_v3  ;;  %v208_v6 = vld [vmem:[%s991_s25 + $0x50] sm:$0xff] (%p29_p3) }
  0x14   : > { %205 = vst [vmem:[%s134_s26 + $0x20] sm:$0xff] (%p29_p3), %v204_v4  ;;  %207 = vst [vmem:[%s134_s26 + $0x28] sm:$0xff] (%p29_p3), %v206_v5  ;;  %v210_v7 = vld [vmem:[%s991_s25 + $0x58] sm:$0xff] (%p29_p3)  ;;  %v212_v8 = vld [vmem:[%s991_s25 + $0x80] sm:$0xff] (%p29_p3) }
  0x15   : > { %209 = vst [vmem:[%s134_s26 + $0x30] sm:$0xff] %v208_v6  ;;  %211 = vst [vmem:[%s134_s26 + $0x38] sm:$0xff] %v210_v7  ;;  %v214_v9 = vld [vmem:[%s991_s25 + $0x88] sm:$0xff]  ;;  %v216_v10 = vld [vmem:[%s991_s25 + $0x90] sm:$0xff] }
  0x16   : > { %213 = vst [vmem:[%s134_s26 + $0x40] sm:$0xff] %v212_v8  ;;  %v218_v11 = vld [vmem:[%s991_s25 + $0x98] sm:$0xff]  ;;  %215 = vst [vmem:[%s134_s26 + $0x48] sm:$0xff] %v214_v9  ;;  %v220_v12 = vld [vmem:[%s991_s25 + $0xc0] sm:$0xff] }
  0x17   : > { %217 = vst [vmem:[%s134_s26 + $0x50] sm:$0xff] %v216_v10  ;;  %219 = vst [vmem:[%s134_s26 + $0x58] sm:$0xff] %v218_v11  ;;  %v222_v13 = vld [vmem:[%s991_s25 + $0xc8] sm:$0xff]  ;;  %v224_v14 = vld [vmem:[%s991_s25 + $0xd0] sm:$0xff] }
  0x18   : > { %221 = vst [vmem:[%s134_s26 + $0x60] sm:$0xff] %v220_v12  ;;  %223 = vst [vmem:[%s134_s26 + $0x68] sm:$0xff] %v222_v13  ;;  %v226_v15 = vld [vmem:[%s991_s25 + $0xd8] sm:$0xff] }
  0x19   : > { %225 = vst [vmem:[%s134_s26 + $0x70] sm:$0xff] %v224_v14  ;;  %227 = vst [vmem:[%s134_s26 + $0x78] sm:$0xff] %v226_v15 }
  0x1a PF: > { %p779_p5 = scmp.ge.s32.totalorder %s934_s14, 1  ;;  %p232_p6 = scmp.lt.s32.totalorder %s934_s14, 3 }
  0x1c   : > { %p233_p7 = pnand %p779_p5, %p232_p6 }
  0x1d   : > { %v1014_v16 = vld [vmem:[%s1163_s1] sm:$0xff] (!%p233_p7)   ;;  %v936_v17 = vmov (!%p233_p7), 0   ;;  %v1023_v18 = vld [vmem:[%s1163_s1 + $0x8] sm:$0xff] (!%p233_p7)   ;;  %s239_s4 = sand.u32 (!%p233_p7), 1, %s926_s12   ;;  %v1033_v19 = vld [vmem:[%s1163_s1 + $0x10] sm:$0xff] (!%p233_p7)   ;;  %vm372_vm0 = vcmask (!%p233_p7), 261120  }
  0x1e   : > { %236 = sbr.rel (%p233_p7) target bundleno = 343 (0x157), region = 66  ;;  %379 = vmatprep.subr.bf16.mxu0 (!%p233_p7), %v936_v17  ;;  %457 = vmatprep.subr.bf16.mxu1 (!%p233_p7), %v936_v17  ;;  %s780_s5 = sshll.u32 (!%p233_p7), %s239_s4, 7  ;;  %v1042_v20 = vld [vmem:[%s1163_s1 + $0x18] sm:$0xff] (!%p233_p7)   ;;  %v1056_v23 = vld [vmem:[%s1163_s1 + $0x20] sm:$0xff] (!%p233_p7)   ;;  %v1066_v24 = vld [vmem:[%s1163_s1 + $0x28] sm:$0xff] (!%p233_p7)  }
  0x1f   : > { %380 = vmatpush1.bf16.msra.mxu0 (!%p233_p7), %v1014_v16  ;;  %458 = vmatpush1.bf16.msra.mxu1 (!%p233_p7), %v1014_v16  ;;  %s1044_s10 = scalar_lea.vmem (!%p233_p7), [#allocation2], %s780_s5  ;;  %v884_v25 = vld [vmem:[%s1163_s1 + $0x30] sm:$0xff] (!%p233_p7)   ;;  %v885_v26 = vld [vmem:[%s1163_s1 + $0x38] sm:$0xff] (!%p233_p7)   ;;  %v886_v27 = vld [vmem:[%s1163_s1 + $0x40] sm:$0xff] (!%p233_p7)   ;;  %s781_s28 = sshll.u32 (!%p233_p7), %s771_s15, 2 }
  0x20   : > { %381 = vmatprep.subr.bf16.mxu0 (!%p233_p7), %v936_v17  ;;  %459 = vmatprep.subr.bf16.mxu1 (!%p233_p7), %v936_v17  ;;  %v890_v21 = vld [vmem:[%s1044_s10 + $0x4] ss:$8 sps:$4 sm:$0xff] (!%p233_p7)   ;;  %v888_v29 = vld [vmem:[%s1044_s10] ss:$8 sps:$4 sm:$0xff] (!%p233_p7)   ;;  %v894_v31 = vld [vmem:[%s1044_s10 + $0x14] ss:$8 sps:$4 sm:$0xff] (!%p233_p7)  }
  0x21   : > { %v893_v22 = vld [vmem:[%s1044_s10 + $0x24] ss:$8 sps:$4 sm:$0xff] (!%p233_p7)   ;;  %797 = vmatprep.mubr.msk.bf16.mxu0 (!%p233_p7), %vm372_vm0, %v890_v21  ;;  %v891_v30 = vld [vmem:[%s1044_s10 + $0x20] ss:$8 sps:$4 sm:$0xff] (!%p233_p7)   ;;  %v897_v32 = vld [vmem:[%s1044_s10 + $0x34] ss:$8 sps:$4 sm:$0xff] (!%p233_p7)  }
  0x22   : > { %807 = vmatprep.mubr.msk.bf16.mxu1 (!%p233_p7), %vm372_vm0, %v893_v22  ;;  %v887_v28 = vld [vmem:[%s1163_s1 + $0x48] sm:$0xff] (!%p233_p7)   ;;  %v896_v33 = vld [vmem:[%s1044_s10 + $0x10] ss:$8 sps:$4 sm:$0xff] (!%p233_p7)   ;;  %v906_v39 = vld [vmem:[%s1044_s10 + $0x54] ss:$8 sps:$4 sm:$0xff] (!%p233_p7)   ;;  %p264_p8 = scmp.lt.s32.totalorder (!%p233_p7), %s781_s28, 7 }
  0x23   : > { %382 = vmatpush1.bf16.msra.mxu0 (!%p233_p7), %v1023_v18  ;;  %460 = vmatpush1.bf16.msra.mxu1 (!%p233_p7), %v1023_v18  ;;  %v899_v34 = vld [vmem:[%s1044_s10 + $0x30] ss:$8 sps:$4 sm:$0xff] (!%p233_p7)   ;;  %v902_v35 = vld [vmem:[%s1044_s10 + $0x44] ss:$8 sps:$4 sm:$0xff] (!%p233_p7)   ;;  %v900_v37 = vld [vmem:[%s1044_s10 + $0x40] ss:$8 sps:$4 sm:$0xff] (!%p233_p7)  }
  0x24   : > { %383 = vmatprep.subr.bf16.mxu0 (!%p233_p7), %v936_v17  ;;  %461 = vmatprep.subr.bf16.mxu1 (!%p233_p7), %v936_v17  ;;  %v905_v36 = vld [vmem:[%s1044_s10 + $0x64] ss:$8 sps:$4 sm:$0xff] (!%p233_p7)   ;;  %v903_v38 = vld [vmem:[%s1044_s10 + $0x60] ss:$8 sps:$4 sm:$0xff] (!%p233_p7)   ;;  %v908_v40 = vld [vmem:[%s1044_s10 + $0x74] ss:$8 sps:$4 sm:$0xff] (!%p233_p7)  }
  0x25   : > { %v910_v41 = vld [vmem:[%s1044_s10 + $0x50] ss:$8 sps:$4 sm:$0xff]   ;;  %v829_v4 = vld [vmem:[%s1164_s2] ss:$0 sm:$0xff]  ;;  %s1170_s28 = smov (!%p264_p8, %s781_s28), 7 }
  0x26   : > { %v911_v42 = vld [vmem:[%s1044_s10 + $0x70] ss:$8 sps:$4 sm:$0xff]   ;;  %s782_s14 = sshll.u32 %s1170_s28, 2 }
  0x27   : > { %384 = vmatpush1.bf16.msra.mxu0 %v1033_v19  ;;  %462 = vmatpush1.bf16.msra.mxu1 %v1033_v19  ;;  %s267_s5 = scalar_lea.vmem %s1165_s3, %s782_s14 }
  0x28   : > { %385 = vmatprep.subr.bf16.mxu0 %v936_v17  ;;  %463 = vmatprep.subr.bf16.mxu1 %v936_v17 }
  0x2b   : > { %386 = vmatpush1.bf16.msra.mxu0 %v1042_v20  ;;  %464 = vmatpush1.bf16.msra.mxu1 %v1042_v20 }
  0x2c   : > { %387 = vmatprep.subr.bf16.mxu0 %v936_v17  ;;  %465 = vmatprep.subr.bf16.mxu1 %v936_v17 }
  0x2f   : > { %388 = vmatpush1.bf16.msra.mxu0 %v1056_v23  ;;  %466 = vmatpush1.bf16.msra.mxu1 %v1056_v23 }
  0x30   : > { %389 = vmatprep.subr.bf16.mxu0 %v936_v17  ;;  %467 = vmatprep.subr.bf16.mxu1 %v936_v17 }
  0x33   : > { %390 = vmatpush1.bf16.msra.mxu0 %v1066_v24  ;;  %468 = vmatpush1.bf16.msra.mxu1 %v1066_v24 }
  0x34   : > { %391 = vmatprep.subr.bf16.mxu0 %v936_v17  ;;  %469 = vmatprep.subr.bf16.mxu1 %v936_v17 }
  0x37   : > { %392 = vmatpush1.bf16.msra.mxu0 %v884_v25  ;;  %470 = vmatpush1.bf16.msra.mxu1 %v884_v25 }
  0x38   : > { %393 = vmatprep.subr.bf16.mxu0 %v936_v17  ;;  %471 = vmatprep.subr.bf16.mxu1 %v936_v17 }
  0x3b   : > { %394 = vmatpush1.bf16.msra.mxu0 %v885_v26  ;;  %472 = vmatpush1.bf16.msra.mxu1 %v885_v26 }
  0x3c   : > { %395 = vmatprep.subr.bf16.mxu0 %v936_v17  ;;  %473 = vmatprep.subr.bf16.mxu1 %v936_v17 }
  0x3f   : > { %396 = vmatpush1.bf16.msra.mxu0 %v886_v27  ;;  %474 = vmatpush1.bf16.msra.mxu1 %v886_v27 }
  0x40   : > { %397 = vmatprep.subr.bf16.mxu0 %v936_v17  ;;  %475 = vmatprep.subr.bf16.mxu1 %v936_v17 }
  0x43   : > { %398 = vmatpush1.bf16.msra.mxu0 %v887_v28  ;;  %476 = vmatpush1.bf16.msra.mxu1 %v887_v28 }
  0x44   : > { %539 = vmatprep.subr.bf16.mxu0 %v936_v17  ;;  %621 = vmatprep.subr.bf16.mxu1 %v936_v17 }
  0x46   : > { %412 = vmatmul.mubr.bf16.vlgmr.msra.gmra.mrb[0].mxu0 %v888_v29  ;;  %490 = vmatmul.mubr.bf16.vlgmr.msra.gmra.mrb[0].mxu1 %v891_v30 }
  0x47   : > { %540 = vmatpush1.bf16.msra.mxu0 %v1014_v16  ;;  %622 = vmatpush1.bf16.msra.mxu1 %v1014_v16 }
  0x48   : > { %541 = vmatprep.subr.bf16.mxu0 %v936_v17  ;;  %623 = vmatprep.subr.bf16.mxu1 %v936_v17 }
  0x49   : > { %798 = vmatprep.mubr.msk.bf16.mxu0 %vm372_vm0, %v894_v31  ;;  %808 = vmatprep.mubr.msk.bf16.mxu1 %vm372_vm0, %v897_v32 }
  0x4b   : > { %542 = vmatpush1.bf16.msra.mxu0 %v1023_v18  ;;  %624 = vmatpush1.bf16.msra.mxu1 %v1023_v18 }
  0x4c   : > { %543 = vmatprep.subr.bf16.mxu0 %v936_v17  ;;  %625 = vmatprep.subr.bf16.mxu1 %v936_v17 }
  0x4e   : > { %420 = vmatmul.mubr.bf16.gmra.mrb[4].mxu0 %v896_v33  ;;  %498 = vmatmul.mubr.bf16.gmra.mrb[4].mxu1 %v899_v34 }
  0x4f   : > { %544 = vmatpush1.bf16.msra.mxu0 %v1033_v19  ;;  %626 = vmatpush1.bf16.msra.mxu1 %v1033_v19 }
  0x50   : > { %545 = vmatprep.subr.bf16.mxu0 %v936_v17  ;;  %627 = vmatprep.subr.bf16.mxu1 %v936_v17 }
  0x51   : > { %817 = vmatprep.mubr.msk.bf16.mxu0 %vm372_vm0, %v902_v35  ;;  %827 = vmatprep.mubr.msk.bf16.mxu1 %vm372_vm0, %v905_v36 }
  0x53   : > { %546 = vmatpush1.bf16.msra.mxu0 %v1042_v20  ;;  %628 = vmatpush1.bf16.msra.mxu1 %v1042_v20 }
  0x54   : > { %547 = vmatprep.subr.bf16.mxu0 %v936_v17  ;;  %629 = vmatprep.subr.bf16.mxu1 %v936_v17 }
  0x57   : > { %548 = vmatpush1.bf16.msra.mxu0 %v1056_v23  ;;  %630 = vmatpush1.bf16.msra.mxu1 %v1056_v23 }
  0x58   : > { %549 = vmatprep.subr.bf16.mxu0 %v936_v17  ;;  %631 = vmatprep.subr.bf16.mxu1 %v936_v17 }
  0x5b   : > { %550 = vmatpush1.bf16.msra.mxu0 %v1066_v24  ;;  %632 = vmatpush1.bf16.msra.mxu1 %v1066_v24 }
  0x5c   : > { %551 = vmatprep.subr.bf16.mxu0 %v936_v17  ;;  %633 = vmatprep.subr.bf16.mxu1 %v936_v17 }
  0x5f   : > { %552 = vmatpush1.bf16.msra.mxu0 %v884_v25  ;;  %634 = vmatpush1.bf16.msra.mxu1 %v884_v25 }
  0x60   : > { %553 = vmatprep.subr.bf16.mxu0 %v936_v17  ;;  %635 = vmatprep.subr.bf16.mxu1 %v936_v17 }
  0x63   : > { %554 = vmatpush1.bf16.msra.mxu0 %v885_v26  ;;  %636 = vmatpush1.bf16.msra.mxu1 %v885_v26 }
  0x64   : > { %555 = vmatprep.subr.bf16.mxu0 %v936_v17  ;;  %637 = vmatprep.subr.bf16.mxu1 %v936_v17 }
  0x67   : > { %556 = vmatpush1.bf16.msra.mxu0 %v886_v27  ;;  %638 = vmatpush1.bf16.msra.mxu1 %v886_v27 }
  0x68   : > { %557 = vmatprep.subr.bf16.mxu0 %v936_v17  ;;  %639 = vmatprep.subr.bf16.mxu1 %v936_v17 }
  0x6b   : > { %558 = vmatpush1.bf16.msra.mxu0 %v887_v28  ;;  %640 = vmatpush1.bf16.msra.mxu1 %v887_v28 }
  0x6e   : > { %572 = vmatmul.mubr.bf16.vlgmr.msra.gmra.mrb[8].mxu0 %v900_v37  ;;  %654 = vmatmul.mubr.bf16.vlgmr.msra.gmra.mrb[8].mxu1 %v903_v38 }
  0x6f   : > { %818 = vmatprep.mubr.msk.bf16.mxu0 %vm372_vm0, %v906_v39  ;;  %828 = vmatprep.mubr.msk.bf16.mxu1 %vm372_vm0, %v908_v40 }
  0x76   : > { %580 = vmatmul.mubr.bf16.gmra.mrb[12].mxu0 %v910_v41  ;;  %662 = vmatmul.mubr.bf16.gmra.mrb[12].mxu1 %v911_v42 }
 0x119   : > { %v413_v43 = vpop.f32.mrb[0].mxu0  ;;  %v491_v44 = vpop.f32.mrb[0].mxu1 }
 0x11a   : > { %v506_v45 = vmax.f32 %v413_v43, %v491_v44  ;;  %v415_v46 = vpop.f32.mrb[1].mxu0  ;;  %v493_v47 = vpop.f32.mrb[1].mxu1 }
 0x11b   : > { %v416_v48 = vpop.f32.mrb[2].mxu0  ;;  %v494_v49 = vpop.f32.mrb[2].mxu1 }
 0x11c   : > { %v507_v50 = vmax.f32 %v416_v48, %v494_v49  ;;  %v418_v51 = vpop.f32.mrb[3].mxu0  ;;  %v496_v52 = vpop.f32.mrb[3].mxu1 }
 0x121   : > { %v421_v53 = vpop.f32.mrb[4].mxu0  ;;  %v499_v54 = vpop.f32.mrb[4].mxu1 }
 0x122   : > { %v423_v55 = vpop.f32.mrb[5].mxu0  ;;  %v508_v56 = vmax.f32 %v421_v53, %v499_v54  ;;  %v501_v57 = vpop.f32.mrb[5].mxu1 }
 0x123   : > { %v424_v58 = vpop.f32.mrb[6].mxu0  ;;  %v502_v59 = vpop.f32.mrb[6].mxu1 }
 0x124   : > { %v426_v60 = vpop.f32.mrb[7].mxu0  ;;  %v509_v61 = vmax.f32 %v424_v58, %v502_v59  ;;  %v504_v62 = vpop.f32.mrb[7].mxu1 }
 0x141   : > { %v573_v63 = vpop.f32.mrb[8].mxu0  ;;  %v655_v0 = vpop.f32.mrb[8].mxu1 }
 0x142   : > { %v588_v1 = vmax.f32 %v506_v45, %v573_v63  ;;  %v575_v2 = vpop.f32.mrb[9].mxu0  ;;  %v657_v3 = vpop.f32.mrb[9].mxu1 }
 0x143   : > { %v576_v5 = vpop.f32.mrb[10].mxu0  ;;  %v658_v6 = vpop.f32.mrb[10].mxu1 }
 0x144   : > { %v670_v7 = vmax.f32 %v588_v1, %v655_v0  ;;  %v589_v8 = vmax.f32 %v507_v50, %v576_v5  ;;  %v578_v9 = vpop.f32.mrb[11].mxu0  ;;  %v660_v10 = vpop.f32.mrb[11].mxu1 }
 0x146   : > { %v681_v11 = vadd.f32 %v829_v4, %v670_v7  ;;  %v671_v12 = vmax.f32 %v589_v8, %v658_v6 }
 0x148   : > { %v682_v13 = vadd.f32 %v829_v4, %v671_v12  ;;  %v685_v16 = vmax.f32 %v681_v11, 0.0 }
 0x149   : > { %v581_v14 = vpop.f32.mrb[12].mxu0  ;;  %v663_v15 = vpop.f32.mrb[12].mxu1 }
 0x14a   : > { %v686_v17 = vmax.f32 %v682_v13, 0.0  ;;  %v590_v18 = vmax.f32 %v508_v56, %v581_v14  ;;  %v583_v19 = vpop.f32.mrb[13].mxu0  ;;  %v665_v20 = vpop.f32.mrb[13].mxu1 }
 0x14b   : > { %v584_v21 = vpop.f32.mrb[14].mxu0  ;;  %v666_v22 = vpop.f32.mrb[14].mxu1 }
 0x14c   : > { %v845_v23 = vpack.c.bf16 %v686_v17, %v685_v16  ;;  %v672_v24 = vmax.f32 %v590_v18, %v663_v15  ;;  %v591_v25 = vmax.f32 %v509_v61, %v584_v21  ;;  %v586_v26 = vpop.f32.mrb[15].mxu0  ;;  %v668_v27 = vpop.f32.mrb[15].mxu1 }
 0x14e   : > { %846 = vst [vmem:[%s267_s5] sm:$0xff] %v845_v23   ;;  %v683_v28 = vadd.f32 %v829_v4, %v672_v24  ;;  %v673_v29 = vmax.f32 %v591_v25, %v666_v22 }
 0x150   : > { %v684_v30 = vadd.f32 %v829_v4, %v673_v29  ;;  %v687_v31 = vmax.f32 %v683_v28, 0.0 }
 0x152   : > { %v688_v32 = vmax.f32 %v684_v30, 0.0 }
 0x154   : > { %v850_v33 = vpack.c.bf16 %v688_v32, %v687_v31 }
 0x156   : > { %852 = vst [vmem:[%s267_s5 + $0x8] sm:$0xff] %v850_v33  }
 0x157 PF: > { %p10_p9 = scmp.ge.s32.totalorder %s974_s16, 4   ;;  %s1166_s12 = smov %s930_s13 }
 0x158   : > { %s1167_s13 = smov %s983_s19  ;;  %s1168_s14 = smov %s974_s16 }
 0x159   :  { %12 = sbr.rel (!%p10_p9) target bundleno = 2 (0x2), region = 108 }

// kernel: net_forward.5
= control target key start
LH: loop header
LB: loop body
LE: loop exit
PB: predicated region body
PF: predicated region fallthrough
CT: control target
= control target key end

     0   :  { %v1012_v34 = vmov 0.0   ;;  %vm1013_vm0 = vmmov 0   ;;  %s1292_s1 = inlined_call_operand.vmem [shape: bf16[512,128], index: 1, kind: input, shape index: {}]   ;;  %s1293_s0 = inlined_call_operand.vmem [shape: bf16[16,512], index: 0, kind: input, shape index: {}]   ;;  %s1294_s3 = inlined_call_operand.vmem [shape: bf16[128,128], index: 3, kind: input, shape index: {}]   ;;  %s1295_s5 = inlined_call_operand.vmem [shape: bf16[128,128], index: 5, kind: input, shape index: {}]   ;;  %s1296_s2 = inlined_call_operand.vmem [shape: f32[1,128], index: 2, kind: input, shape index: {}]   ;;  %s1297_s7 = inlined_call_operand.vmem [shape: bf16[128,128], index: 7, kind: input, shape index: {}]   ;;  %s1298_s4 = inlined_call_operand.vmem [shape: f32[1,128], index: 4, kind: input, shape index: {}]   ;;  %s1299_s6 = inlined_call_operand.vmem [shape: f32[1,128], index: 6, kind: input, shape index: {}]   ;;  %s1300_s8 = inlined_call_operand.vmem [shape: f32[1,128], index: 8, kind: input, shape index: {}]   ;;  %s1301_s9 = inlined_call_operand.vmem [shape: f32[16,128], index: 9, kind: output, shape index: {}]  }
   0x1   :  { %v950_v0 = vld [vmem:[%s1292_s1 + $0x40] sm:$0xff]   ;;  %v954_v4 = vld [vmem:[%s1292_s1 + $0x48] sm:$0xff]   ;;  %v958_v8 = vld [vmem:[%s1292_s1 + $0x50] sm:$0xff]  }
   0x2   :  { %v951_v1 = vld [vmem:[%s1292_s1 + $0xc0] sm:$0xff]   ;;  %817 = vmatprep.subr.bf16.mxu0 %v950_v0  ;;  %v955_v5 = vld [vmem:[%s1292_s1 + $0xc8] sm:$0xff]   ;;  %v959_v9 = vld [vmem:[%s1292_s1 + $0xd0] sm:$0xff]  }
   0x3   :  { %v952_v2 = vld [vmem:[%s1292_s1] sm:$0xff]   ;;  %839 = vmatprep.subr.bf16.mxu1 %v951_v1  ;;  %v956_v6 = vld [vmem:[%s1292_s1 + $0x8] sm:$0xff]   ;;  %v960_v10 = vld [vmem:[%s1292_s1 + $0x10] sm:$0xff]  }
   0x4   :  { %v953_v3 = vld [vmem:[%s1292_s1 + $0x80] sm:$0xff]   ;;  %818 = vmatpush3.bf16.msra.mxu0 %v952_v2  ;;  %v957_v7 = vld [vmem:[%s1292_s1 + $0x88] sm:$0xff]   ;;  %v961_v11 = vld [vmem:[%s1292_s1 + $0x90] sm:$0xff]  }
   0x5   :  { %840 = vmatpush3.bf16.msra.mxu1 %v953_v3  ;;  %819 = vmatprep.subr.bf16.mxu0 %v954_v4  ;;  %v962_v12 = vld [vmem:[%s1292_s1 + $0x58] sm:$0xff]   ;;  %v966_v16 = vld [vmem:[%s1292_s1 + $0x60] sm:$0xff]   ;;  %v970_v20 = vld [vmem:[%s1292_s1 + $0x68] sm:$0xff]  }
   0x6   :  { %841 = vmatprep.subr.bf16.mxu1 %v955_v5  ;;  %v963_v13 = vld [vmem:[%s1292_s1 + $0xd8] sm:$0xff]   ;;  %v967_v17 = vld [vmem:[%s1292_s1 + $0xe0] sm:$0xff]   ;;  %v971_v21 = vld [vmem:[%s1292_s1 + $0xe8] sm:$0xff]  }
   0x7   :  { %v964_v14 = vld [vmem:[%s1292_s1 + $0x18] sm:$0xff]   ;;  %v968_v18 = vld [vmem:[%s1292_s1 + $0x20] sm:$0xff]   ;;  %v972_v22 = vld [vmem:[%s1292_s1 + $0x28] sm:$0xff]  }
   0x8   :  { %820 = vmatpush3.bf16.msra.mxu0 %v956_v6  ;;  %v965_v15 = vld [vmem:[%s1292_s1 + $0x98] sm:$0xff]   ;;  %v969_v19 = vld [vmem:[%s1292_s1 + $0xa0] sm:$0xff]   ;;  %v973_v23 = vld [vmem:[%s1292_s1 + $0xa8] sm:$0xff]  }
   0x9   :  { %842 = vmatpush3.bf16.msra.mxu1 %v957_v7  ;;  %821 = vmatprep.subr.bf16.mxu0 %v958_v8  ;;  %v974_v24 = vld [vmem:[%s1292_s1 + $0x70] sm:$0xff]   ;;  %v978_v28 = vld [vmem:[%s1292_s1 + $0x78] sm:$0xff]   ;;  %v988_v37 = vld [vmem:[%s1294_s3] sm:$0xff]  }
   0xa   :  { %843 = vmatprep.subr.bf16.mxu1 %v959_v9  ;;  %v975_v25 = vld [vmem:[%s1292_s1 + $0xf0] sm:$0xff]   ;;  %v979_v29 = vld [vmem:[%s1292_s1 + $0xf8] sm:$0xff]   ;;  %v989_v38 = vld [vmem:[%s1294_s3 + $0x8] sm:$0xff]  }
   0xb   :  { %v976_v26 = vld [vmem:[%s1292_s1 + $0x30] sm:$0xff]   ;;  %v980_v30 = vld [vmem:[%s1292_s1 + $0x38] sm:$0xff]   ;;  %v992_v41 = vld [vmem:[%s1294_s3 + $0x20] sm:$0xff]  }
   0xc   :  { %822 = vmatpush3.bf16.msra.mxu0 %v960_v10  ;;  %v977_v27 = vld [vmem:[%s1292_s1 + $0xb0] sm:$0xff]   ;;  %v981_v31 = vld [vmem:[%s1292_s1 + $0xb8] sm:$0xff]   ;;  %v993_v42 = vld [vmem:[%s1294_s3 + $0x28] sm:$0xff]  }
   0xd   :  { %844 = vmatpush3.bf16.msra.mxu1 %v961_v11  ;;  %823 = vmatprep.subr.bf16.mxu0 %v962_v12  ;;  %v982_v32 = vld [vmem:[%s1293_s0] ss:$16 sps:$4 sm:$0xff]   ;;  %v984_v33 = vld [vmem:[%s1293_s0 + $0x4] ss:$16 sps:$4 sm:$0xff]   ;;  %v985_v35 = vld [vmem:[%s1293_s0 + $0x8] ss:$16 sps:$4 sm:$0xff]  }
   0xe   :  { %845 = vmatprep.subr.bf16.mxu1 %v963_v13  ;;  %v987_v36 = vld [vmem:[%s1293_s0 + $0xc] ss:$16 sps:$4 sm:$0xff]   ;;  %352 = vmatprep.mubr.bf16.mxu0 %v984_v33  ;;  %v990_v39 = vld [vmem:[%s1294_s3 + $0x10] sm:$0xff]   ;;  %v996_v45 = vld [vmem:[%s1295_s5] sm:$0xff]  }
   0xf   :  { %393 = vmatprep.mubr.bf16.mxu1 %v987_v36  ;;  %v991_v40 = vld [vmem:[%s1294_s3 + $0x18] sm:$0xff]   ;;  %v994_v43 = vld [vmem:[%s1294_s3 + $0x30] sm:$0xff]   ;;  %v997_v46 = vld [vmem:[%s1295_s5 + $0x8] sm:$0xff]  }
  0x10   :  { %824 = vmatpush3.bf16.msra.mxu0 %v964_v14  ;;  %v995_v44 = vld [vmem:[%s1294_s3 + $0x38] sm:$0xff]   ;;  %v998_v47 = vld [vmem:[%s1295_s5 + $0x10] sm:$0xff]   ;;  %v1000_v49 = vld [vmem:[%s1295_s5 + $0x20] sm:$0xff]  }
  0x11   :  { %846 = vmatpush3.bf16.msra.mxu1 %v965_v15  ;;  %825 = vmatprep.subr.bf16.mxu0 %v966_v16  ;;  %v999_v48 = vld [vmem:[%s1295_s5 + $0x18] sm:$0xff]   ;;  %v1001_v50 = vld [vmem:[%s1295_s5 + $0x28] sm:$0xff]   ;;  %v753_v53 = vld [vmem:[%s1296_s2] ss:$0 sm:$0xff] }
  0x12   :  { %847 = vmatprep.subr.bf16.mxu1 %v967_v17  ;;  %v1002_v7 = vld [vmem:[%s1295_s5 + $0x30] sm:$0xff]   ;;  %v1003_v8 = vld [vmem:[%s1295_s5 + $0x38] sm:$0xff]   ;;  %v1004_v9 = vld [vmem:[%s1297_s7] sm:$0xff]  }
  0x13   :  { %v1005_v10 = vld [vmem:[%s1297_s7 + $0x8] sm:$0xff]   ;;  %v1006_v11 = vld [vmem:[%s1297_s7 + $0x10] sm:$0xff]   ;;  %v1007_v12 = vld [vmem:[%s1297_s7 + $0x18] sm:$0xff]  }
  0x14   :  { %826 = vmatpush3.bf16.msra.mxu0 %v968_v18  ;;  %v1008_v13 = vld [vmem:[%s1297_s7 + $0x20] sm:$0xff]   ;;  %v1009_v14 = vld [vmem:[%s1297_s7 + $0x28] sm:$0xff]  }
  0x15   :  { %848 = vmatpush3.bf16.msra.mxu1 %v969_v19  ;;  %827 = vmatprep.subr.bf16.mxu0 %v970_v20  ;;  %v790_v15 = vld [vmem:[%s1298_s4] ss:$0 sm:$0xff] }
  0x16   :  { %849 = vmatprep.subr.bf16.mxu1 %v971_v21 }
  0x18   :  { %828 = vmatpush3.bf16.msra.mxu0 %v972_v22 }
  0x19   :  { %850 = vmatpush3.bf16.msra.mxu1 %v973_v23  ;;  %829 = vmatprep.subr.bf16.mxu0 %v974_v24 }
  0x1a   :  { %851 = vmatprep.subr.bf16.mxu1 %v975_v25  ;;  %v1010_v25 = vld [vmem:[%s1297_s7 + $0x30] sm:$0xff]  }
  0x1c   :  { %830 = vmatpush3.bf16.msra.mxu0 %v976_v26  ;;  %v1011_v26 = vld [vmem:[%s1297_s7 + $0x38] sm:$0xff]  }
  0x1d   :  { %852 = vmatpush3.bf16.msra.mxu1 %v977_v27  ;;  %831 = vmatprep.subr.bf16.mxu0 %v978_v28  ;;  %v799_v27 = vld [vmem:[%s1299_s6] ss:$0 sm:$0xff] }
  0x1e   :  { %853 = vmatprep.subr.bf16.mxu1 %v979_v29 }
  0x20   :  { %832 = vmatpush3.bf16.msra.mxu0 %v980_v30 }
  0x21   :  { %854 = vmatpush3.bf16.msra.mxu1 %v981_v31  ;;  %888 = vmatprep.subr.bf16.mxu0 %v1012_v34 }
  0x22   :  { %908 = vmatprep.subr.bf16.mxu1 %v1012_v34 }
  0x23   :  { %353 = vmatmul.mubr.bf16.vlgmr.msra.gmra.mrb[0].mxu0 %v982_v32 }
  0x24   :  { %394 = vmatmul.mubr.bf16.vlgmr.msra.gmra.mrb[0].mxu1 %v985_v35  ;;  %889 = vmatpush3.bf16.msra.mxu0 %v988_v37 }
  0x25   :  { %890 = vmatprep.subr.bf16.mxu0 %v1012_v34  ;;  %904 = vmatprep.mubr.msk.bf16.mxu0 %vm1013_vm0, %v1012_v34 }
  0x26   :  { %924 = vmatprep.mubr.msk.bf16.mxu1 %vm1013_vm0, %v1012_v34  ;;  %909 = vmatpush3.bf16.msra.mxu1 %v996_v45 }
  0x27   :  { %910 = vmatprep.subr.bf16.mxu1 %v1012_v34 }
  0x28   :  { %891 = vmatpush3.bf16.msra.mxu0 %v989_v38 }
  0x29   :  { %892 = vmatprep.subr.bf16.mxu0 %v1012_v34 }
  0x2a   :  { %911 = vmatpush3.bf16.msra.mxu1 %v997_v46 }
  0x2b   :  { %912 = vmatprep.subr.bf16.mxu1 %v1012_v34 }
  0x2c   :  { %893 = vmatpush3.bf16.msra.mxu0 %v990_v39 }
  0x2d   :  { %894 = vmatprep.subr.bf16.mxu0 %v1012_v34 }
  0x2e   :  { %913 = vmatpush3.bf16.msra.mxu1 %v998_v47 }
  0x2f   :  { %914 = vmatprep.subr.bf16.mxu1 %v1012_v34 }
  0x30   :  { %895 = vmatpush3.bf16.msra.mxu0 %v991_v40 }
  0x31   :  { %896 = vmatprep.subr.bf16.mxu0 %v1012_v34 }
  0x32   :  { %915 = vmatpush3.bf16.msra.mxu1 %v999_v48 }
  0x33   :  { %916 = vmatprep.subr.bf16.mxu1 %v1012_v34 }
  0x34   :  { %897 = vmatpush3.bf16.msra.mxu0 %v992_v41 }
  0x35   :  { %898 = vmatprep.subr.bf16.mxu0 %v1012_v34 }
  0x36   :  { %917 = vmatpush3.bf16.msra.mxu1 %v1000_v49 }
  0x37   :  { %918 = vmatprep.subr.bf16.mxu1 %v1012_v34 }
  0x38   :  { %899 = vmatpush3.bf16.msra.mxu0 %v993_v42 }
  0x39   :  { %900 = vmatprep.subr.bf16.mxu0 %v1012_v34 }
  0x3a   :  { %919 = vmatpush3.bf16.msra.mxu1 %v1001_v50 }
  0x3b   :  { %920 = vmatprep.subr.bf16.mxu1 %v1012_v34 }
  0x3c   :  { %901 = vmatpush3.bf16.msra.mxu0 %v994_v43 }
  0x3d   :  { %902 = vmatprep.subr.bf16.mxu0 %v1012_v34 }
  0x3e   :  { %921 = vmatpush3.bf16.msra.mxu1 %v1002_v7 }
  0x3f   :  { %922 = vmatprep.subr.bf16.mxu1 %v1012_v34 }
  0x40   :  { %903 = vmatpush3.bf16.msra.mxu0 %v995_v44 }
  0x41   :  { %928 = vmatprep.subr.bf16.mxu0 %v1012_v34 }
  0x42   :  { %923 = vmatpush3.bf16.msra.mxu1 %v1003_v8 }
  0xf6   :  { %v833_v51 = vpop.f32.mrb[0].mxu0 }
  0xf7   :  { %v855_v52 = vpop.f32.mrb[0].mxu1  ;;  %v834_v54 = vpop.f32.mrb[1].mxu0 }
  0xf8   :  { %v835_v55 = vadd.f32 %v834_v54, %v833_v51  ;;  %v856_v56 = vpop.f32.mrb[1].mxu1  ;;  %v836_v57 = vpop.f32.mrb[2].mxu0 }
  0xf9   :  { %v857_v58 = vadd.f32 %v856_v56, %v855_v52  ;;  %v858_v59 = vpop.f32.mrb[2].mxu1  ;;  %v837_v60 = vpop.f32.mrb[3].mxu0 }
  0xfa   :  { %v355_v61 = vadd.f32 %v835_v55, %v753_v53  ;;  %v838_v62 = vadd.f32 %v837_v60, %v836_v57  ;;  %v859_v63 = vpop.f32.mrb[3].mxu1 }
  0xfb   :  { %v860_v0 = vadd.f32 %v859_v63, %v858_v59 }
  0xfc   :  { %v396_v1 = vadd.f32 %v857_v58, %v355_v61  ;;  %v358_v2 = vadd.f32 %v838_v62, %v753_v53 }
  0xfe   :  { %v399_v3 = vadd.f32 %v860_v0, %v358_v2  ;;  %v402_v4 = vmax.f32 %v396_v1, 0.0 }
 0x100   :  { %v403_v5 = vmax.f32 %v399_v3, 0.0 }
 0x102   :  { %v404_v6 = vpack.c.bf16 %v403_v5, %v402_v4 }
 0x104   :  { %905 = vmatmul.mubr.bf16.vlgmr.msra.gmra.mrb[4].mxu0 %v404_v6 }
 0x105   :  { %944 = vmatprep.mubr.msk.bf16.mxu0 %vm1013_vm0, %v1012_v34  ;;  %929 = vmatpush3.bf16.msra.mxu0 %v1004_v9 }
 0x106   :  { %930 = vmatprep.subr.bf16.mxu0 %v1012_v34 }
 0x109   :  { %931 = vmatpush3.bf16.msra.mxu0 %v1005_v10 }
 0x10a   :  { %932 = vmatprep.subr.bf16.mxu0 %v1012_v34 }
 0x10d   :  { %933 = vmatpush3.bf16.msra.mxu0 %v1006_v11 }
 0x10e   :  { %934 = vmatprep.subr.bf16.mxu0 %v1012_v34 }
 0x111   :  { %935 = vmatpush3.bf16.msra.mxu0 %v1007_v12 }
 0x112   :  { %936 = vmatprep.subr.bf16.mxu0 %v1012_v34 }
 0x115   :  { %937 = vmatpush3.bf16.msra.mxu0 %v1008_v13 }
 0x116   :  { %938 = vmatprep.subr.bf16.mxu0 %v1012_v34 }
 0x119   :  { %939 = vmatpush3.bf16.msra.mxu0 %v1009_v14 }
 0x11a   :  { %940 = vmatprep.subr.bf16.mxu0 %v1012_v34 }
 0x11d   :  { %941 = vmatpush3.bf16.msra.mxu0 %v1010_v25 }
 0x11e   :  { %942 = vmatprep.subr.bf16.mxu0 %v1012_v34  ;;  %v808_v34 = vld [vmem:[%s1300_s8] ss:$0 sm:$0xff] }
 0x121   :  { %943 = vmatpush3.bf16.msra.mxu0 %v1011_v26 }
 0x1d7   :  { %v510_v16 = vpop.f32.mrb[4].mxu0 }
 0x1d8   :  { %v511_v17 = vadd.f32 %v790_v15, %v510_v16  ;;  %v906_v18 = vpop.f32.mrb[5].mxu0 }
 0x1d9   :  { %v513_v19 = vpop.f32.mrb[6].mxu0 }
 0x1da   :  { %v514_v20 = vadd.f32 %v790_v15, %v513_v19  ;;  %v907_v21 = vpop.f32.mrb[7].mxu0  ;;  %v517_v22 = vmax.f32 %v511_v17, 0.0 }
 0x1dc   :  { %v518_v23 = vmax.f32 %v514_v20, 0.0 }
 0x1de   :  { %v519_v24 = vpack.c.bf16 %v518_v23, %v517_v22 }
 0x1e0   :  { %925 = vmatmul.mubr.bf16.vlgmr.msra.gmra.mrb[4].mxu1 %v519_v24 }
 0x2b3   :  { %v625_v28 = vpop.f32.mrb[4].mxu1 }
 0x2b4   :  { %v626_v29 = vadd.f32 %v799_v27, %v625_v28  ;;  %v926_v30 = vpop.f32.mrb[5].mxu1 }
 0x2b5   :  { %v628_v31 = vpop.f32.mrb[6].mxu1 }
 0x2b6   :  { %v629_v32 = vadd.f32 %v799_v27, %v628_v31  ;;  %v927_v33 = vpop.f32.mrb[7].mxu1  ;;  %v632_v35 = vmax.f32 %v626_v29, 0.0 }
 0x2b8   :  { %v633_v36 = vmax.f32 %v629_v32, 0.0 }
 0x2ba   :  { %v634_v37 = vpack.c.bf16 %v633_v36, %v632_v35 }
 0x2bc   :  { %945 = vmatmul.mubr.bf16.vlgmr.msra.gmra.mrb[8].mxu0 %v634_v37 }
 0x38f   :  { %v740_v38 = vpop.f32.mrb[8].mxu0 }
 0x390   :  { %v741_v39 = vadd.f32 %v808_v34, %v740_v38  ;;  %v946_v40 = vpop.f32.mrb[9].mxu0 }
 0x391   :  { %v743_v41 = vpop.f32.mrb[10].mxu0 }
 0x392   :  { %747 = vst [vmem:[%s1301_s9] sm:$0xff] %v741_v39  ;;  %v744_v42 = vadd.f32 %v808_v34, %v743_v41  ;;  %v947_v43 = vpop.f32.mrb[11].mxu0 }
 0x394   :  { %748 = vst [vmem:[%s1301_s9 + $0x8] sm:$0xff] %v744_v42 }

</bundles_post_ra>
